<compile_context>
chip_gen: v5e
topology: v5e:2x2
jax: 0.10.0
libtpu: 0.0.40
codegen_flags: <defaults>
</compile_context>

<pallas_src>
import jax
import jax.numpy as jnp
from jax.experimental import pallas as pl
from jax.experimental.pallas import tpu as pltpu


def lenet1_kernel(xcol_ref, w1c_ref, b1_ref, pw1_ref, w2b_ref, b2_ref, g_ref,
                  bfc_ref, out_ref, p1_ref):
    Bt = xcol_ref.shape[1]                      # batch tile (multiple of 8)
    mdt = w1c_ref.dtype                         # MXU operand dtype (f32 or bf16)

    w1c = w1c_ref[...]                          # (140, 96)
    b1 = b1_ref[...]                            # (1, 96)
    pw1 = pw1_ref[...]                          # (96, 48)  (1/4 pool scale folded in)
    b2 = b2_ref[...]                            # (1, 96)

    # ---- conv1 (1->4, 5x5) as ONE deep-K GEMM, in 4 independent row chunks ------
    # xcol rows = (h_out, b), cols = ky*28 + w_in  (H-only im2col done in glue).
    # Per-chunk tanh/pool lets EUP/VALU of chunk c overlap MXU of chunk c+1.
    for c in range(4):                          # 4 chunks x 6 output H rows
        lhs = xcol_ref[6 * c:6 * c + 6].reshape(6 * Bt, 140)
        a = jnp.dot(lhs, w1c, preferred_element_type=jnp.float32)
        a = jnp.tanh(a + b1)                    # (6*Bt, 96), cols = oc*24 + wx
        # avg-pool 2x2, H half: pair-add rows (tile aligned since Bt % 8 == 0)
        a = a.reshape(3, 2, Bt, 96)
        a = a[:, 0] + a[:, 1]                   # (3, Bt, 96); /4 scale lives in pw1
        # W half: flat 2-D dot with the (96, 48) block-diag pooling matrix
        p = jnp.dot(a.reshape(3 * Bt, 96).astype(mdt), pw1,
                    preferred_element_type=jnp.float32)
        p1_ref[3 * c:3 * c + 3] = p.reshape(3, Bt, 48).astype(mdt)

    # ---- conv2 (4->12, 5x5): 5 banded GEMMs, 2 row chunks + fused pool2/FC ------
    # p1 rows = (i, b), cols = c*12 + j ; a2 rows = (y, b), cols = oc*8 + x.
    out = None
    for c in range(2):                          # 2 chunks x 4 output y rows
        y0 = 4 * c
        acc = jnp.dot(p1_ref[y0:y0 + 4].reshape(4 * Bt, 48), w2b_ref[0],
                      preferred_element_type=jnp.float32)
        for ry in range(1, 5):                  # acc-chain: MRB in-place acc on v7x
            acc = acc + jnp.dot(p1_ref[y0 + ry:y0 + ry + 4].reshape(4 * Bt, 48),
                                w2b_ref[ry], preferred_element_type=jnp.float32)
        a2 = jnp.tanh(acc + b2).reshape(4, Bt, 96)   # tanh overlaps next chunk's MXU
        # avg-pool2 (x0.25) + NCHW flatten + fc folded into g (glue); N padded to 128.
        for yl in range(4):
            t = jnp.dot(a2[yl].astype(mdt), g_ref[y0 + yl],
                        preferred_element_type=jnp.float32)
            out = t if out is None else out + t
    out_ref[...] = out + bfc_ref[...]           # (Bt, 128) lane-dense; [:, :10] valid


def _fold_params(w1, b1, w2, b2, wfc, bfc, mxu_dtype):
    """Fold conv kernels / pools / flatten into flat GEMM matrices (runs once, in glue)."""
    # conv1 column matrix: w1c[ky*28 + w_in, oc*24 + wx] = w1[oc, 0, ky, w_in - wx]
    w1s = w1[:, 0]                                            # (4, 5, 5)
    d1 = jnp.arange(28)[:, None] - jnp.arange(24)[None, :]    # (28, 24) = kx
    m1 = (d1 >= 0) & (d1 < 5)
    v1 = w1s[:, :, jnp.clip(d1, 0, 4)]                        # (4, 5, 28, 24)
    v1 = jnp.where(m1[None, None], v1, 0.0)
    w1c = jnp.transpose(v1, (1, 2, 0, 3)).reshape(140, 96)

    # conv2 band matrices: w2b[ry, c*12 + j_in, oc*8 + x] = w2[oc, c, ry, j_in - x]
    d2 = jnp.arange(12)[:, None] - jnp.arange(8)[None, :]     # (12, 8) = rx
    m2 = (d2 >= 0) & (d2 < 5)
    v2 = w2[:, :, :, jnp.clip(d2, 0, 4)]                      # (12, 4, 5, 12, 8)
    v2 = jnp.where(m2[None, None, None], v2, 0.0)
    w2b = jnp.transpose(v2, (2, 1, 3, 0, 4)).reshape(5, 48, 96)

    # pool1 W-half, block-diag over oc, with the FULL 1/4 average scale folded in
    pw1 = jnp.kron(jnp.eye(4, dtype=jnp.float32),
                   jnp.repeat(jnp.eye(12, dtype=jnp.float32), 2, axis=0) * 0.25)

    # fc with pool2 (x0.25) + PyTorch (C,H,W) flatten folded in; lane-padded to 128
    wfcr = wfc.reshape(10, 12, 4, 4)                          # [k, oc, u, v]
    half = jnp.arange(8) // 2
    g = wfcr[:, :, :, half][:, :, half, :]                    # [k, oc, y, x]
    g = 0.25 * jnp.transpose(g, (2, 1, 3, 0)).reshape(8, 96, 10)
    g = jnp.pad(g, ((0, 0), (0, 0), (0, 118)))                # (8, 96, 128) lane-dense
    bfcp = jnp.pad(bfc.reshape(1, 10), ((0, 0), (0, 118)))    # (1, 128)

    b1c = jnp.repeat(b1, 24).reshape(1, 96)                   # col = oc*24 + wx
    b2c = jnp.repeat(b2, 8).reshape(1, 96)                    # col = oc*8 + x
    return (w1c.astype(mxu_dtype), b1c, pw1.astype(mxu_dtype),
            w2b.astype(mxu_dtype), b2c, g.astype(mxu_dtype), bfcp)


def lenet1_forward(x, params, block_b=256, mxu_dtype=jnp.float32):
    """x: (B, 1, 28, 28) float32 NCHW (PyTorch layout). Returns (B, 10) logits.

    block_b: batch tile (multiple of 8), clamped to the padded batch.  256 is a good
    default on v5e/v6e; on v7x keep it <= Bpad/2 so both TensorCores get grid steps.
    mxu_dtype: jnp.bfloat16 on v6e/v7x cuts MXU passes ~2-3x (f32 accumulation kept);
    default f32 matches the reference to <5e-4.
    """
    w1, b1, w2, b2, wfc, bfc = params
    B = x.shape[0]
    Bt = max(8, (min(block_b, ((B + 7) // 8) * 8) // 8) * 8)  # multiple of 8, <= Bpad
    Bpad = ((B + Bt - 1) // Bt) * Bt

    # --- glue (tiny, runs once per call): H-only im2col + folded weights ---------
    xs = x[:, 0]                                              # (B, 28, 28)
    hidx = jnp.arange(24)[:, None] + jnp.arange(5)[None, :]   # (24, 5)
    xw = xs[:, hidx, :]                                       # (B, 24, 5, 28)
    xcol = jnp.transpose(xw, (1, 0, 2, 3)).reshape(24, B, 140)  # [h_out, b, ky*28+w]
    xcol = jnp.pad(xcol, ((0, 0), (0, Bpad - B), (0, 0))).astype(mxu_dtype)

    w1c, b1c, pw1, w2b, b2c, g, bfcp = _fold_params(w1, b1, w2, b2, wfc, bfc,
                                                    mxu_dtype)

    out = pl.pallas_call(
        lenet1_kernel,
        out_shape=jax.ShapeDtypeStruct((Bpad, 128), jnp.float32),
        grid=(Bpad // Bt,),
        in_specs=[
            pl.BlockSpec((24, Bt, 140), lambda i: (0, i, 0)),  # im2col'd images
            pl.BlockSpec((140, 96), lambda i: (0, 0)),         # conv1 column matrix
            pl.BlockSpec((1, 96), lambda i: (0, 0)),           # conv1 bias per column
            pl.BlockSpec((96, 48), lambda i: (0, 0)),          # pool1 W-pool matrix
            pl.BlockSpec((5, 48, 96), lambda i: (0, 0, 0)),    # conv2 band matrices
            pl.BlockSpec((1, 96), lambda i: (0, 0)),           # conv2 bias per column
            pl.BlockSpec((8, 96, 128), lambda i: (0, 0, 0)),   # pool2+flatten+fc
            pl.BlockSpec((1, 128), lambda i: (0, 0)),          # fc bias (lane-padded)
        ],
        out_specs=pl.BlockSpec((Bt, 128), lambda i: (i, 0)),
        scratch_shapes=[pltpu.VMEM((12, Bt, 48), mxu_dtype)],  # pool1 output staging
        compiler_params=pltpu.CompilerParams(
            dimension_semantics=("parallel",)),
    )(xcol, w1c, b1c, pw1, w2b, b2c, g, bfcp)
    return out[:B, :10]


def reference_forward(x, params):
    """Pure-JAX reference with identical semantics to the PyTorch module."""
    w1, b1, w2, b2, wfc, bfc = params
    dn = ('NCHW', 'OIHW', 'NCHW')
    y = jax.lax.conv_general_dilated(x, w1, (1, 1), 'VALID',
                                     dimension_numbers=dn) + b1[None, :, None, None]
    y = jnp.tanh(y)
    y = jax.lax.reduce_window(y, 0.0, jax.lax.add, (1, 1, 2, 2), (1, 1, 2, 2),
                              'VALID') / 4.0
    y = jax.lax.conv_general_dilated(y, w2, (1, 1), 'VALID',
                                     dimension_numbers=dn) + b2[None, :, None, None]
    y = jnp.tanh(y)
    y = jax.lax.reduce_window(y, 0.0, jax.lax.add, (1, 1, 2, 2), (1, 1, 2, 2),
                              'VALID') / 4.0
    y = y.reshape(x.shape[0], -1)
    return y @ wfc.T + bfc


if __name__ == "__main__":
    key = jax.random.PRNGKey(0)
    kx, k1, k2, k3, k4, k5, k6 = jax.random.split(key, 7)

    # deterministic synthetic parameters (shapes from LeNet1.__init__)
    w1 = jax.random.normal(k1, (4, 1, 5, 5), jnp.float32) * 0.2    # Conv2d(1, 4, 5)
    b1 = jax.random.normal(k2, (4,), jnp.float32) * 0.1
    w2 = jax.random.normal(k3, (12, 4, 5, 5), jnp.float32) * 0.1   # Conv2d(4, 12, 5)
    b2 = jax.random.normal(k4, (12,), jnp.float32) * 0.1
    wfc = jax.random.normal(k5, (10, 192), jnp.float32) * 0.05     # Linear(192, 10)
    bfc = jax.random.normal(k6, (10,), jnp.float32) * 0.05
    params = (w1, b1, w2, b2, wfc, bfc)

    # MNIST-shaped input: batch=2, NCHW (1, 28, 28) so fc sees 12*4*4 = 192 features
    x = jax.random.normal(kx, (2, 1, 28, 28), jnp.float32)

    out = jax.jit(lenet1_forward)(x, params)
    out = jax.block_until_ready(out)
    assert out.shape == (2, 10) and out.dtype == jnp.float32

    ref = jax.block_until_ready(reference_forward(x, params))
    assert jnp.allclose(out, ref, atol=5e-4, rtol=5e-4), \
        f"max abs diff {jnp.max(jnp.abs(out - ref))}"

    print("KERNEL_OK")
</pallas_src>

<mosaic_0001>
module attributes {stable_mosaic.version = 11 : i64} {
  func.func @lenet1_kernel(%arg0: i32, %arg1: memref<24x8x140xf32, #tpu.memory_space<vmem>>, %arg2: memref<140x96xf32, #tpu.memory_space<vmem>>, %arg3: memref<1x96xf32, #tpu.memory_space<vmem>>, %arg4: memref<96x48xf32, #tpu.memory_space<vmem>>, %arg5: memref<5x48x96xf32, #tpu.memory_space<vmem>>, %arg6: memref<1x96xf32, #tpu.memory_space<vmem>>, %arg7: memref<8x96x128xf32, #tpu.memory_space<vmem>>, %arg8: memref<1x128xf32, #tpu.memory_space<vmem>>, %arg9: memref<8x128xf32, #tpu.memory_space<vmem>>, %arg10: memref<12x8x48xf32, #tpu.memory_space<vmem>>) attributes {dimension_semantics = [#tpu.dimension_semantics<parallel>], iteration_bounds = array<i64: 1>, scalar_prefetch = 0 : i64, scratch_operands = 1 : i64, tpu.core_type = #tpu.core_type<tc>, window_params = [{transform_indices = @transform_0, window_bounds = array<i64: 24, 8, 140>}, {pipeline_mode = #tpu.pipeline_mode<synchronous>, transform_indices = @transform_1, window_bounds = array<i64: 140, 96>}, {pipeline_mode = #tpu.pipeline_mode<synchronous>, transform_indices = @transform_2, window_bounds = array<i64: 1, 96>}, {pipeline_mode = #tpu.pipeline_mode<synchronous>, transform_indices = @transform_3, window_bounds = array<i64: 96, 48>}, {pipeline_mode = #tpu.pipeline_mode<synchronous>, transform_indices = @transform_4, window_bounds = array<i64: 5, 48, 96>}, {pipeline_mode = #tpu.pipeline_mode<synchronous>, transform_indices = @transform_5, window_bounds = array<i64: 1, 96>}, {pipeline_mode = #tpu.pipeline_mode<synchronous>, transform_indices = @transform_6, window_bounds = array<i64: 8, 96, 128>}, {pipeline_mode = #tpu.pipeline_mode<synchronous>, transform_indices = @transform_7, window_bounds = array<i64: 1, 128>}, {transform_indices = @transform_8, window_bounds = array<i64: 8, 128>}]} {
    %c0 = arith.constant 0 : index
    %c0_0 = arith.constant 0 : index
    %0 = vector.load %arg2[%c0, %c0_0] : memref<140x96xf32, #tpu.memory_space<vmem>>, vector<140x96xf32>
    %c0_1 = arith.constant 0 : index
    %c0_2 = arith.constant 0 : index
    %1 = vector.load %arg3[%c0_1, %c0_2] : memref<1x96xf32, #tpu.memory_space<vmem>>, vector<1x96xf32>
    %c0_3 = arith.constant 0 : index
    %c0_4 = arith.constant 0 : index
    %2 = vector.load %arg4[%c0_3, %c0_4] : memref<96x48xf32, #tpu.memory_space<vmem>>, vector<96x48xf32>
    %c0_5 = arith.constant 0 : index
    %c0_6 = arith.constant 0 : index
    %3 = vector.load %arg6[%c0_5, %c0_6] : memref<1x96xf32, #tpu.memory_space<vmem>>, vector<1x96xf32>
    %c0_7 = arith.constant 0 : index
    %c0_8 = arith.constant 0 : index
    %c0_9 = arith.constant 0 : index
    %4 = vector.load %arg1[%c0_7, %c0_8, %c0_9] : memref<24x8x140xf32, #tpu.memory_space<vmem>>, vector<6x8x140xf32>
    %5 = vector.shape_cast %4 : vector<6x8x140xf32> to vector<48x140xf32>
    %cst = arith.constant dense<0.000000e+00> : vector<48x96xf32>
    %6 = tpu.matmul %5, %0, %cst {dimension_numbers = #tpu.dot_dimension_numbers<[1], [0], [0], [1], [0, 0, 1, 1], [], []>} : vector<48x140xf32>, vector<140x96xf32>, vector<48x96xf32> -> vector<48x96xf32>
    %7 = vector.broadcast %1 : vector<1x96xf32> to vector<48x96xf32>
    %8 = arith.addf %6, %7 : vector<48x96xf32>
    %9 = math.tanh %8 : vector<48x96xf32>
    %10 = vector.shape_cast %9 : vector<48x96xf32> to vector<3x2x8x96xf32>
    %11 = vector.extract_strided_slice %10 {offsets = [0, 0, 0, 0], sizes = [3, 1, 8, 96], strides = [1, 1, 1, 1]} : vector<3x2x8x96xf32> to vector<3x1x8x96xf32>
    %12 = vector.shape_cast %11 : vector<3x1x8x96xf32> to vector<3x8x96xf32>
    %13 = vector.extract_strided_slice %10 {offsets = [0, 1, 0, 0], sizes = [3, 1, 8, 96], strides = [1, 1, 1, 1]} : vector<3x2x8x96xf32> to vector<3x1x8x96xf32>
    %14 = vector.shape_cast %13 : vector<3x1x8x96xf32> to vector<3x8x96xf32>
    %15 = arith.addf %12, %14 : vector<3x8x96xf32>
    %16 = vector.shape_cast %15 : vector<3x8x96xf32> to vector<24x96xf32>
    %cst_10 = arith.constant dense<0.000000e+00> : vector<24x48xf32>
    %17 = tpu.matmul %16, %2, %cst_10 {dimension_numbers = #tpu.dot_dimension_numbers<[1], [0], [0], [1], [0, 0, 1, 1], [], []>} : vector<24x96xf32>, vector<96x48xf32>, vector<24x48xf32> -> vector<24x48xf32>
    %18 = vector.shape_cast %17 : vector<24x48xf32> to vector<3x8x48xf32>
    %c0_11 = arith.constant 0 : index
    %c0_12 = arith.constant 0 : index
    %c0_13 = arith.constant 0 : index
    %19 = vector.load %arg10[%c0_11, %c0_12, %c0_13] : memref<12x8x48xf32, #tpu.memory_space<vmem>>, vector<3x8x48xf32>
    tpu.vector_store %arg10[%c0_11, %c0_12, %c0_13], %18 {strides = array<i32>} : memref<12x8x48xf32, #tpu.memory_space<vmem>>, vector<3x8x48xf32>,
    %c6 = arith.constant 6 : index
    %c0_14 = arith.constant 0 : index
    %c0_15 = arith.constant 0 : index
    %20 = vector.load %arg1[%c6, %c0_14, %c0_15] : memref<24x8x140xf32, #tpu.memory_space<vmem>>, vector<6x8x140xf32>
    %21 = vector.shape_cast %20 : vector<6x8x140xf32> to vector<48x140xf32>
    %cst_16 = arith.constant dense<0.000000e+00> : vector<48x96xf32>
    %22 = tpu.matmul %21, %0, %cst_16 {dimension_numbers = #tpu.dot_dimension_numbers<[1], [0], [0], [1], [0, 0, 1, 1], [], []>} : vector<48x140xf32>, vector<140x96xf32>, vector<48x96xf32> -> vector<48x96xf32>
    %23 = vector.broadcast %1 : vector<1x96xf32> to vector<48x96xf32>
    %24 = arith.addf %22, %23 : vector<48x96xf32>
    %25 = math.tanh %24 : vector<48x96xf32>
    %26 = vector.shape_cast %25 : vector<48x96xf32> to vector<3x2x8x96xf32>
    %27 = vector.extract_strided_slice %26 {offsets = [0, 0, 0, 0], sizes = [3, 1, 8, 96], strides = [1, 1, 1, 1]} : vector<3x2x8x96xf32> to vector<3x1x8x96xf32>
    %28 = vector.shape_cast %27 : vector<3x1x8x96xf32> to vector<3x8x96xf32>
    %29 = vector.extract_strided_slice %26 {offsets = [0, 1, 0, 0], sizes = [3, 1, 8, 96], strides = [1, 1, 1, 1]} : vector<3x2x8x96xf32> to vector<3x1x8x96xf32>
    %30 = vector.shape_cast %29 : vector<3x1x8x96xf32> to vector<3x8x96xf32>
    %31 = arith.addf %28, %30 : vector<3x8x96xf32>
    %32 = vector.shape_cast %31 : vector<3x8x96xf32> to vector<24x96xf32>
    %cst_17 = arith.constant dense<0.000000e+00> : vector<24x48xf32>
    %33 = tpu.matmul %32, %2, %cst_17 {dimension_numbers = #tpu.dot_dimension_numbers<[1], [0], [0], [1], [0, 0, 1, 1], [], []>} : vector<24x96xf32>, vector<96x48xf32>, vector<24x48xf32> -> vector<24x48xf32>
    %34 = vector.shape_cast %33 : vector<24x48xf32> to vector<3x8x48xf32>
    %c3 = arith.constant 3 : index
    %c0_18 = arith.constant 0 : index
    %c0_19 = arith.constant 0 : index
    %35 = vector.load %arg10[%c3, %c0_18, %c0_19] : memref<12x8x48xf32, #tpu.memory_space<vmem>>, vector<3x8x48xf32>
    tpu.vector_store %arg10[%c3, %c0_18, %c0_19], %34 {strides = array<i32>} : memref<12x8x48xf32, #tpu.memory_space<vmem>>, vector<3x8x48xf32>,
    %c12 = arith.constant 12 : index
    %c0_20 = arith.constant 0 : index
    %c0_21 = arith.constant 0 : index
    %36 = vector.load %arg1[%c12, %c0_20, %c0_21] : memref<24x8x140xf32, #tpu.memory_space<vmem>>, vector<6x8x140xf32>
    %37 = vector.shape_cast %36 : vector<6x8x140xf32> to vector<48x140xf32>
    %cst_22 = arith.constant dense<0.000000e+00> : vector<48x96xf32>
    %38 = tpu.matmul %37, %0, %cst_22 {dimension_numbers = #tpu.dot_dimension_numbers<[1], [0], [0], [1], [0, 0, 1, 1], [], []>} : vector<48x140xf32>, vector<140x96xf32>, vector<48x96xf32> -> vector<48x96xf32>
    %39 = vector.broadcast %1 : vector<1x96xf32> to vector<48x96xf32>
    %40 = arith.addf %38, %39 : vector<48x96xf32>
    %41 = math.tanh %40 : vector<48x96xf32>
    %42 = vector.shape_cast %41 : vector<48x96xf32> to vector<3x2x8x96xf32>
    %43 = vector.extract_strided_slice %42 {offsets = [0, 0, 0, 0], sizes = [3, 1, 8, 96], strides = [1, 1, 1, 1]} : vector<3x2x8x96xf32> to vector<3x1x8x96xf32>
    %44 = vector.shape_cast %43 : vector<3x1x8x96xf32> to vector<3x8x96xf32>
    %45 = vector.extract_strided_slice %42 {offsets = [0, 1, 0, 0], sizes = [3, 1, 8, 96], strides = [1, 1, 1, 1]} : vector<3x2x8x96xf32> to vector<3x1x8x96xf32>
    %46 = vector.shape_cast %45 : vector<3x1x8x96xf32> to vector<3x8x96xf32>
    %47 = arith.addf %44, %46 : vector<3x8x96xf32>
    %48 = vector.shape_cast %47 : vector<3x8x96xf32> to vector<24x96xf32>
    %cst_23 = arith.constant dense<0.000000e+00> : vector<24x48xf32>
    %49 = tpu.matmul %48, %2, %cst_23 {dimension_numbers = #tpu.dot_dimension_numbers<[1], [0], [0], [1], [0, 0, 1, 1], [], []>} : vector<24x96xf32>, vector<96x48xf32>, vector<24x48xf32> -> vector<24x48xf32>
    %50 = vector.shape_cast %49 : vector<24x48xf32> to vector<3x8x48xf32>
    %c6_24 = arith.constant 6 : index
    %c0_25 = arith.constant 0 : index
    %c0_26 = arith.constant 0 : index
    %51 = vector.load %arg10[%c6_24, %c0_25, %c0_26] : memref<12x8x48xf32, #tpu.memory_space<vmem>>, vector<3x8x48xf32>
    tpu.vector_store %arg10[%c6_24, %c0_25, %c0_26], %50 {strides = array<i32>} : memref<12x8x48xf32, #tpu.memory_space<vmem>>, vector<3x8x48xf32>,
    %c18 = arith.constant 18 : index
    %c0_27 = arith.constant 0 : index
    %c0_28 = arith.constant 0 : index
    %52 = vector.load %arg1[%c18, %c0_27, %c0_28] : memref<24x8x140xf32, #tpu.memory_space<vmem>>, vector<6x8x140xf32>
    %53 = vector.shape_cast %52 : vector<6x8x140xf32> to vector<48x140xf32>
    %cst_29 = arith.constant dense<0.000000e+00> : vector<48x96xf32>
    %54 = tpu.matmul %53, %0, %cst_29 {dimension_numbers = #tpu.dot_dimension_numbers<[1], [0], [0], [1], [0, 0, 1, 1], [], []>} : vector<48x140xf32>, vector<140x96xf32>, vector<48x96xf32> -> vector<48x96xf32>
    %55 = vector.broadcast %1 : vector<1x96xf32> to vector<48x96xf32>
    %56 = arith.addf %54, %55 : vector<48x96xf32>
    %57 = math.tanh %56 : vector<48x96xf32>
    %58 = vector.shape_cast %57 : vector<48x96xf32> to vector<3x2x8x96xf32>
    %59 = vector.extract_strided_slice %58 {offsets = [0, 0, 0, 0], sizes = [3, 1, 8, 96], strides = [1, 1, 1, 1]} : vector<3x2x8x96xf32> to vector<3x1x8x96xf32>
    %60 = vector.shape_cast %59 : vector<3x1x8x96xf32> to vector<3x8x96xf32>
    %61 = vector.extract_strided_slice %58 {offsets = [0, 1, 0, 0], sizes = [3, 1, 8, 96], strides = [1, 1, 1, 1]} : vector<3x2x8x96xf32> to vector<3x1x8x96xf32>
    %62 = vector.shape_cast %61 : vector<3x1x8x96xf32> to vector<3x8x96xf32>
    %63 = arith.addf %60, %62 : vector<3x8x96xf32>
    %64 = vector.shape_cast %63 : vector<3x8x96xf32> to vector<24x96xf32>
    %cst_30 = arith.constant dense<0.000000e+00> : vector<24x48xf32>
    %65 = tpu.matmul %64, %2, %cst_30 {dimension_numbers = #tpu.dot_dimension_numbers<[1], [0], [0], [1], [0, 0, 1, 1], [], []>} : vector<24x96xf32>, vector<96x48xf32>, vector<24x48xf32> -> vector<24x48xf32>
    %66 = vector.shape_cast %65 : vector<24x48xf32> to vector<3x8x48xf32>
    %c9 = arith.constant 9 : index
    %c0_31 = arith.constant 0 : index
    %c0_32 = arith.constant 0 : index
    %67 = vector.load %arg10[%c9, %c0_31, %c0_32] : memref<12x8x48xf32, #tpu.memory_space<vmem>>, vector<3x8x48xf32>
    tpu.vector_store %arg10[%c9, %c0_31, %c0_32], %66 {strides = array<i32>} : memref<12x8x48xf32, #tpu.memory_space<vmem>>, vector<3x8x48xf32>,
    %c0_33 = arith.constant 0 : index
    %c0_34 = arith.constant 0 : index
    %c0_35 = arith.constant 0 : index
    %68 = vector.load %arg10[%c0_33, %c0_34, %c0_35] : memref<12x8x48xf32, #tpu.memory_space<vmem>>, vector<4x8x48xf32>
    %69 = vector.shape_cast %68 : vector<4x8x48xf32> to vector<32x48xf32>
    %c0_36 = arith.constant 0 : index
    %c0_37 = arith.constant 0 : index
    %c0_38 = arith.constant 0 : index
    %70 = vector.load %arg5[%c0_36, %c0_37, %c0_38] : memref<5x48x96xf32, #tpu.memory_space<vmem>>, vector<1x48x96xf32>
    %71 = vector.shape_cast %70 : vector<1x48x96xf32> to vector<48x96xf32>
    %cst_39 = arith.constant dense<0.000000e+00> : vector<32x96xf32>
    %72 = tpu.matmul %69, %71, %cst_39 {dimension_numbers = #tpu.dot_dimension_numbers<[1], [0], [0], [1], [0, 0, 1, 1], [], []>} : vector<32x48xf32>, vector<48x96xf32>, vector<32x96xf32> -> vector<32x96xf32>
    %c1 = arith.constant 1 : index
    %c0_40 = arith.constant 0 : index
    %c0_41 = arith.constant 0 : index
    %73 = vector.load %arg10[%c1, %c0_40, %c0_41] : memref<12x8x48xf32, #tpu.memory_space<vmem>>, vector<4x8x48xf32>
    %74 = vector.shape_cast %73 : vector<4x8x48xf32> to vector<32x48xf32>
    %c1_42 = arith.constant 1 : index
    %c0_43 = arith.constant 0 : index
    %c0_44 = arith.constant 0 : index
    %75 = vector.load %arg5[%c1_42, %c0_43, %c0_44] : memref<5x48x96xf32, #tpu.memory_space<vmem>>, vector<1x48x96xf32>
    %76 = vector.shape_cast %75 : vector<1x48x96xf32> to vector<48x96xf32>
    %cst_45 = arith.constant dense<0.000000e+00> : vector<32x96xf32>
    %77 = tpu.matmul %74, %76, %cst_45 {dimension_numbers = #tpu.dot_dimension_numbers<[1], [0], [0], [1], [0, 0, 1, 1], [], []>} : vector<32x48xf32>, vector<48x96xf32>, vector<32x96xf32> -> vector<32x96xf32>
    %78 = arith.addf %72, %77 : vector<32x96xf32>
    %c2 = arith.constant 2 : index
    %c0_46 = arith.constant 0 : index
    %c0_47 = arith.constant 0 : index
    %79 = vector.load %arg10[%c2, %c0_46, %c0_47] : memref<12x8x48xf32, #tpu.memory_space<vmem>>, vector<4x8x48xf32>
    %80 = vector.shape_cast %79 : vector<4x8x48xf32> to vector<32x48xf32>
    %c2_48 = arith.constant 2 : index
    %c0_49 = arith.constant 0 : index
    %c0_50 = arith.constant 0 : index
    %81 = vector.load %arg5[%c2_48, %c0_49, %c0_50] : memref<5x48x96xf32, #tpu.memory_space<vmem>>, vector<1x48x96xf32>
    %82 = vector.shape_cast %81 : vector<1x48x96xf32> to vector<48x96xf32>
    %cst_51 = arith.constant dense<0.000000e+00> : vector<32x96xf32>
    %83 = tpu.matmul %80, %82, %cst_51 {dimension_numbers = #tpu.dot_dimension_numbers<[1], [0], [0], [1], [0, 0, 1, 1], [], []>} : vector<32x48xf32>, vector<48x96xf32>, vector<32x96xf32> -> vector<32x96xf32>
    %84 = arith.addf %78, %83 : vector<32x96xf32>
    %c3_52 = arith.constant 3 : index
    %c0_53 = arith.constant 0 : index
    %c0_54 = arith.constant 0 : index
    %85 = vector.load %arg10[%c3_52, %c0_53, %c0_54] : memref<12x8x48xf32, #tpu.memory_space<vmem>>, vector<4x8x48xf32>
    %86 = vector.shape_cast %85 : vector<4x8x48xf32> to vector<32x48xf32>
    %c3_55 = arith.constant 3 : index
    %c0_56 = arith.constant 0 : index
    %c0_57 = arith.constant 0 : index
    %87 = vector.load %arg5[%c3_55, %c0_56, %c0_57] : memref<5x48x96xf32, #tpu.memory_space<vmem>>, vector<1x48x96xf32>
    %88 = vector.shape_cast %87 : vector<1x48x96xf32> to vector<48x96xf32>
    %cst_58 = arith.constant dense<0.000000e+00> : vector<32x96xf32>
    %89 = tpu.matmul %86, %88, %cst_58 {dimension_numbers = #tpu.dot_dimension_numbers<[1], [0], [0], [1], [0, 0, 1, 1], [], []>} : vector<32x48xf32>, vector<48x96xf32>, vector<32x96xf32> -> vector<32x96xf32>
    %90 = arith.addf %84, %89 : vector<32x96xf32>
    %c4 = arith.constant 4 : index
    %c0_59 = arith.constant 0 : index
    %c0_60 = arith.constant 0 : index
    %91 = vector.load %arg10[%c4, %c0_59, %c0_60] : memref<12x8x48xf32, #tpu.memory_space<vmem>>, vector<4x8x48xf32>
    %92 = vector.shape_cast %91 : vector<4x8x48xf32> to vector<32x48xf32>
    %c4_61 = arith.constant 4 : index
    %c0_62 = arith.constant 0 : index
    %c0_63 = arith.constant 0 : index
    %93 = vector.load %arg5[%c4_61, %c0_62, %c0_63] : memref<5x48x96xf32, #tpu.memory_space<vmem>>, vector<1x48x96xf32>
    %94 = vector.shape_cast %93 : vector<1x48x96xf32> to vector<48x96xf32>
    %cst_64 = arith.constant dense<0.000000e+00> : vector<32x96xf32>
    %95 = tpu.matmul %92, %94, %cst_64 {dimension_numbers = #tpu.dot_dimension_numbers<[1], [0], [0], [1], [0, 0, 1, 1], [], []>} : vector<32x48xf32>, vector<48x96xf32>, vector<32x96xf32> -> vector<32x96xf32>
    %96 = arith.addf %90, %95 : vector<32x96xf32>
    %97 = vector.broadcast %3 : vector<1x96xf32> to vector<32x96xf32>
    %98 = arith.addf %96, %97 : vector<32x96xf32>
    %99 = math.tanh %98 : vector<32x96xf32>
    %100 = vector.shape_cast %99 : vector<32x96xf32> to vector<4x8x96xf32>
    %101 = vector.extract_strided_slice %100 {offsets = [0, 0, 0], sizes = [1, 8, 96], strides = [1, 1, 1]} : vector<4x8x96xf32> to vector<1x8x96xf32>
    %102 = vector.shape_cast %101 : vector<1x8x96xf32> to vector<8x96xf32>
    %c0_65 = arith.constant 0 : index
    %c0_66 = arith.constant 0 : index
    %c0_67 = arith.constant 0 : index
    %103 = vector.load %arg7[%c0_65, %c0_66, %c0_67] : memref<8x96x128xf32, #tpu.memory_space<vmem>>, vector<1x96x128xf32>
    %104 = vector.shape_cast %103 : vector<1x96x128xf32> to vector<96x128xf32>
    %cst_68 = arith.constant dense<0.000000e+00> : vector<8x128xf32>
    %105 = tpu.matmul %102, %104, %cst_68 {dimension_numbers = #tpu.dot_dimension_numbers<[1], [0], [0], [1], [0, 0, 1, 1], [], []>} : vector<8x96xf32>, vector<96x128xf32>, vector<8x128xf32> -> vector<8x128xf32>
    %106 = vector.extract_strided_slice %100 {offsets = [1, 0, 0], sizes = [1, 8, 96], strides = [1, 1, 1]} : vector<4x8x96xf32> to vector<1x8x96xf32>
    %107 = vector.shape_cast %106 : vector<1x8x96xf32> to vector<8x96xf32>
    %c1_69 = arith.constant 1 : index
    %c0_70 = arith.constant 0 : index
    %c0_71 = arith.constant 0 : index
    %108 = vector.load %arg7[%c1_69, %c0_70, %c0_71] : memref<8x96x128xf32, #tpu.memory_space<vmem>>, vector<1x96x128xf32>
    %109 = vector.shape_cast %108 : vector<1x96x128xf32> to vector<96x128xf32>
    %cst_72 = arith.constant dense<0.000000e+00> : vector<8x128xf32>
    %110 = tpu.matmul %107, %109, %cst_72 {dimension_numbers = #tpu.dot_dimension_numbers<[1], [0], [0], [1], [0, 0, 1, 1], [], []>} : vector<8x96xf32>, vector<96x128xf32>, vector<8x128xf32> -> vector<8x128xf32>
    %111 = arith.addf %105, %110 : vector<8x128xf32>
    %112 = vector.extract_strided_slice %100 {offsets = [2, 0, 0], sizes = [1, 8, 96], strides = [1, 1, 1]} : vector<4x8x96xf32> to vector<1x8x96xf32>
    %113 = vector.shape_cast %112 : vector<1x8x96xf32> to vector<8x96xf32>
    %c2_73 = arith.constant 2 : index
    %c0_74 = arith.constant 0 : index
    %c0_75 = arith.constant 0 : index
    %114 = vector.load %arg7[%c2_73, %c0_74, %c0_75] : memref<8x96x128xf32, #tpu.memory_space<vmem>>, vector<1x96x128xf32>
    %115 = vector.shape_cast %114 : vector<1x96x128xf32> to vector<96x128xf32>
    %cst_76 = arith.constant dense<0.000000e+00> : vector<8x128xf32>
    %116 = tpu.matmul %113, %115, %cst_76 {dimension_numbers = #tpu.dot_dimension_numbers<[1], [0], [0], [1], [0, 0, 1, 1], [], []>} : vector<8x96xf32>, vector<96x128xf32>, vector<8x128xf32> -> vector<8x128xf32>
    %117 = arith.addf %111, %116 : vector<8x128xf32>
    %118 = vector.extract_strided_slice %100 {offsets = [3, 0, 0], sizes = [1, 8, 96], strides = [1, 1, 1]} : vector<4x8x96xf32> to vector<1x8x96xf32>
    %119 = vector.shape_cast %118 : vector<1x8x96xf32> to vector<8x96xf32>
    %c3_77 = arith.constant 3 : index
    %c0_78 = arith.constant 0 : index
    %c0_79 = arith.constant 0 : index
    %120 = vector.load %arg7[%c3_77, %c0_78, %c0_79] : memref<8x96x128xf32, #tpu.memory_space<vmem>>, vector<1x96x128xf32>
    %121 = vector.shape_cast %120 : vector<1x96x128xf32> to vector<96x128xf32>
    %cst_80 = arith.constant dense<0.000000e+00> : vector<8x128xf32>
    %122 = tpu.matmul %119, %121, %cst_80 {dimension_numbers = #tpu.dot_dimension_numbers<[1], [0], [0], [1], [0, 0, 1, 1], [], []>} : vector<8x96xf32>, vector<96x128xf32>, vector<8x128xf32> -> vector<8x128xf32>
    %123 = arith.addf %117, %122 : vector<8x128xf32>
    %c4_81 = arith.constant 4 : index
    %c0_82 = arith.constant 0 : index
    %c0_83 = arith.constant 0 : index
    %124 = vector.load %arg10[%c4_81, %c0_82, %c0_83] : memref<12x8x48xf32, #tpu.memory_space<vmem>>, vector<4x8x48xf32>
    %125 = vector.shape_cast %124 : vector<4x8x48xf32> to vector<32x48xf32>
    %c0_84 = arith.constant 0 : index
    %c0_85 = arith.constant 0 : index
    %c0_86 = arith.constant 0 : index
    %126 = vector.load %arg5[%c0_84, %c0_85, %c0_86] : memref<5x48x96xf32, #tpu.memory_space<vmem>>, vector<1x48x96xf32>
    %127 = vector.shape_cast %126 : vector<1x48x96xf32> to vector<48x96xf32>
    %cst_87 = arith.constant dense<0.000000e+00> : vector<32x96xf32>
    %128 = tpu.matmul %125, %127, %cst_87 {dimension_numbers = #tpu.dot_dimension_numbers<[1], [0], [0], [1], [0, 0, 1, 1], [], []>} : vector<32x48xf32>, vector<48x96xf32>, vector<32x96xf32> -> vector<32x96xf32>
    %c5 = arith.constant 5 : index
    %c0_88 = arith.constant 0 : index
    %c0_89 = arith.constant 0 : index
    %129 = vector.load %arg10[%c5, %c0_88, %c0_89] : memref<12x8x48xf32, #tpu.memory_space<vmem>>, vector<4x8x48xf32>
    %130 = vector.shape_cast %129 : vector<4x8x48xf32> to vector<32x48xf32>
    %c1_90 = arith.constant 1 : index
    %c0_91 = arith.constant 0 : index
    %c0_92 = arith.constant 0 : index
    %131 = vector.load %arg5[%c1_90, %c0_91, %c0_92] : memref<5x48x96xf32, #tpu.memory_space<vmem>>, vector<1x48x96xf32>
    %132 = vector.shape_cast %131 : vector<1x48x96xf32> to vector<48x96xf32>
    %cst_93 = arith.constant dense<0.000000e+00> : vector<32x96xf32>
    %133 = tpu.matmul %130, %132, %cst_93 {dimension_numbers = #tpu.dot_dimension_numbers<[1], [0], [0], [1], [0, 0, 1, 1], [], []>} : vector<32x48xf32>, vector<48x96xf32>, vector<32x96xf32> -> vector<32x96xf32>
    %134 = arith.addf %128, %133 : vector<32x96xf32>
    %c6_94 = arith.constant 6 : index
    %c0_95 = arith.constant 0 : index
    %c0_96 = arith.constant 0 : index
    %135 = vector.load %arg10[%c6_94, %c0_95, %c0_96] : memref<12x8x48xf32, #tpu.memory_space<vmem>>, vector<4x8x48xf32>
    %136 = vector.shape_cast %135 : vector<4x8x48xf32> to vector<32x48xf32>
    %c2_97 = arith.constant 2 : index
    %c0_98 = arith.constant 0 : index
    %c0_99 = arith.constant 0 : index
    %137 = vector.load %arg5[%c2_97, %c0_98, %c0_99] : memref<5x48x96xf32, #tpu.memory_space<vmem>>, vector<1x48x96xf32>
    %138 = vector.shape_cast %137 : vector<1x48x96xf32> to vector<48x96xf32>
    %cst_100 = arith.constant dense<0.000000e+00> : vector<32x96xf32>
    %139 = tpu.matmul %136, %138, %cst_100 {dimension_numbers = #tpu.dot_dimension_numbers<[1], [0], [0], [1], [0, 0, 1, 1], [], []>} : vector<32x48xf32>, vector<48x96xf32>, vector<32x96xf32> -> vector<32x96xf32>
    %140 = arith.addf %134, %139 : vector<32x96xf32>
    %c7 = arith.constant 7 : index
    %c0_101 = arith.constant 0 : index
    %c0_102 = arith.constant 0 : index
    %141 = vector.load %arg10[%c7, %c0_101, %c0_102] : memref<12x8x48xf32, #tpu.memory_space<vmem>>, vector<4x8x48xf32>
    %142 = vector.shape_cast %141 : vector<4x8x48xf32> to vector<32x48xf32>
    %c3_103 = arith.constant 3 : index
    %c0_104 = arith.constant 0 : index
    %c0_105 = arith.constant 0 : index
    %143 = vector.load %arg5[%c3_103, %c0_104, %c0_105] : memref<5x48x96xf32, #tpu.memory_space<vmem>>, vector<1x48x96xf32>
    %144 = vector.shape_cast %143 : vector<1x48x96xf32> to vector<48x96xf32>
    %cst_106 = arith.constant dense<0.000000e+00> : vector<32x96xf32>
    %145 = tpu.matmul %142, %144, %cst_106 {dimension_numbers = #tpu.dot_dimension_numbers<[1], [0], [0], [1], [0, 0, 1, 1], [], []>} : vector<32x48xf32>, vector<48x96xf32>, vector<32x96xf32> -> vector<32x96xf32>
    %146 = arith.addf %140, %145 : vector<32x96xf32>
    %c8 = arith.constant 8 : index
    %c0_107 = arith.constant 0 : index
    %c0_108 = arith.constant 0 : index
    %147 = vector.load %arg10[%c8, %c0_107, %c0_108] : memref<12x8x48xf32, #tpu.memory_space<vmem>>, vector<4x8x48xf32>
    %148 = vector.shape_cast %147 : vector<4x8x48xf32> to vector<32x48xf32>
    %c4_109 = arith.constant 4 : index
    %c0_110 = arith.constant 0 : index
    %c0_111 = arith.constant 0 : index
    %149 = vector.load %arg5[%c4_109, %c0_110, %c0_111] : memref<5x48x96xf32, #tpu.memory_space<vmem>>, vector<1x48x96xf32>
    %150 = vector.shape_cast %149 : vector<1x48x96xf32> to vector<48x96xf32>
    %cst_112 = arith.constant dense<0.000000e+00> : vector<32x96xf32>
    %151 = tpu.matmul %148, %150, %cst_112 {dimension_numbers = #tpu.dot_dimension_numbers<[1], [0], [0], [1], [0, 0, 1, 1], [], []>} : vector<32x48xf32>, vector<48x96xf32>, vector<32x96xf32> -> vector<32x96xf32>
    %152 = arith.addf %146, %151 : vector<32x96xf32>
    %153 = vector.broadcast %3 : vector<1x96xf32> to vector<32x96xf32>
    %154 = arith.addf %152, %153 : vector<32x96xf32>
    %155 = math.tanh %154 : vector<32x96xf32>
    %156 = vector.shape_cast %155 : vector<32x96xf32> to vector<4x8x96xf32>
    %157 = vector.extract_strided_slice %156 {offsets = [0, 0, 0], sizes = [1, 8, 96], strides = [1, 1, 1]} : vector<4x8x96xf32> to vector<1x8x96xf32>
    %158 = vector.shape_cast %157 : vector<1x8x96xf32> to vector<8x96xf32>
    %c4_113 = arith.constant 4 : index
    %c0_114 = arith.constant 0 : index
    %c0_115 = arith.constant 0 : index
    %159 = vector.load %arg7[%c4_113, %c0_114, %c0_115] : memref<8x96x128xf32, #tpu.memory_space<vmem>>, vector<1x96x128xf32>
    %160 = vector.shape_cast %159 : vector<1x96x128xf32> to vector<96x128xf32>
    %cst_116 = arith.constant dense<0.000000e+00> : vector<8x128xf32>
    %161 = tpu.matmul %158, %160, %cst_116 {dimension_numbers = #tpu.dot_dimension_numbers<[1], [0], [0], [1], [0, 0, 1, 1], [], []>} : vector<8x96xf32>, vector<96x128xf32>, vector<8x128xf32> -> vector<8x128xf32>
    %162 = arith.addf %123, %161 : vector<8x128xf32>
    %163 = vector.extract_strided_slice %156 {offsets = [1, 0, 0], sizes = [1, 8, 96], strides = [1, 1, 1]} : vector<4x8x96xf32> to vector<1x8x96xf32>
    %164 = vector.shape_cast %163 : vector<1x8x96xf32> to vector<8x96xf32>
    %c5_117 = arith.constant 5 : index
    %c0_118 = arith.constant 0 : index
    %c0_119 = arith.constant 0 : index
    %165 = vector.load %arg7[%c5_117, %c0_118, %c0_119] : memref<8x96x128xf32, #tpu.memory_space<vmem>>, vector<1x96x128xf32>
    %166 = vector.shape_cast %165 : vector<1x96x128xf32> to vector<96x128xf32>
    %cst_120 = arith.constant dense<0.000000e+00> : vector<8x128xf32>
    %167 = tpu.matmul %164, %166, %cst_120 {dimension_numbers = #tpu.dot_dimension_numbers<[1], [0], [0], [1], [0, 0, 1, 1], [], []>} : vector<8x96xf32>, vector<96x128xf32>, vector<8x128xf32> -> vector<8x128xf32>
    %168 = arith.addf %162, %167 : vector<8x128xf32>
    %169 = vector.extract_strided_slice %156 {offsets = [2, 0, 0], sizes = [1, 8, 96], strides = [1, 1, 1]} : vector<4x8x96xf32> to vector<1x8x96xf32>
    %170 = vector.shape_cast %169 : vector<1x8x96xf32> to vector<8x96xf32>
    %c6_121 = arith.constant 6 : index
    %c0_122 = arith.constant 0 : index
    %c0_123 = arith.constant 0 : index
    %171 = vector.load %arg7[%c6_121, %c0_122, %c0_123] : memref<8x96x128xf32, #tpu.memory_space<vmem>>, vector<1x96x128xf32>
    %172 = vector.shape_cast %171 : vector<1x96x128xf32> to vector<96x128xf32>
    %cst_124 = arith.constant dense<0.000000e+00> : vector<8x128xf32>
    %173 = tpu.matmul %170, %172, %cst_124 {dimension_numbers = #tpu.dot_dimension_numbers<[1], [0], [0], [1], [0, 0, 1, 1], [], []>} : vector<8x96xf32>, vector<96x128xf32>, vector<8x128xf32> -> vector<8x128xf32>
    %174 = arith.addf %168, %173 : vector<8x128xf32>
    %175 = vector.extract_strided_slice %156 {offsets = [3, 0, 0], sizes = [1, 8, 96], strides = [1, 1, 1]} : vector<4x8x96xf32> to vector<1x8x96xf32>
    %176 = vector.shape_cast %175 : vector<1x8x96xf32> to vector<8x96xf32>
    %c7_125 = arith.constant 7 : index
    %c0_126 = arith.constant 0 : index
    %c0_127 = arith.constant 0 : index
    %177 = vector.load %arg7[%c7_125, %c0_126, %c0_127] : memref<8x96x128xf32, #tpu.memory_space<vmem>>, vector<1x96x128xf32>
    %178 = vector.shape_cast %177 : vector<1x96x128xf32> to vector<96x128xf32>
    %cst_128 = arith.constant dense<0.000000e+00> : vector<8x128xf32>
    %179 = tpu.matmul %176, %178, %cst_128 {dimension_numbers = #tpu.dot_dimension_numbers<[1], [0], [0], [1], [0, 0, 1, 1], [], []>} : vector<8x96xf32>, vector<96x128xf32>, vector<8x128xf32> -> vector<8x128xf32>
    %180 = arith.addf %174, %179 : vector<8x128xf32>
    %c0_129 = arith.constant 0 : index
    %c0_130 = arith.constant 0 : index
    %181 = vector.load %arg8[%c0_129, %c0_130] : memref<1x128xf32, #tpu.memory_space<vmem>>, vector<1x128xf32>
    %182 = vector.broadcast %181 : vector<1x128xf32> to vector<8x128xf32>
    %183 = arith.addf %180, %182 : vector<8x128xf32>
    %c0_131 = arith.constant 0 : index
    %c0_132 = arith.constant 0 : index
    %184 = vector.load %arg9[%c0_131, %c0_132] : memref<8x128xf32, #tpu.memory_space<vmem>>, vector<8x128xf32>
    tpu.vector_store %arg9[%c0_131, %c0_132], %183 {strides = array<i32>} : memref<8x128xf32, #tpu.memory_space<vmem>>, vector<8x128xf32>,
    return
  }
  func.func @transform_0(%arg0: i32) -> (i32, i32, i32) {
    %c0_i32 = arith.constant 0 : i32
    %c0_i32_0 = arith.constant 0 : i32
    %c0_i32_1 = arith.constant 0 : i32
    return %c0_i32, %arg0, %c0_i32_0 : i32, i32, i32
  }
  func.func @transform_1(%arg0: i32) -> (i32, i32) {
    %c0_i32 = arith.constant 0 : i32
    %c0_i32_0 = arith.constant 0 : i32
    %c0_i32_1 = arith.constant 0 : i32
    return %c0_i32, %c0_i32_0 : i32, i32
  }
  func.func @transform_2(%arg0: i32) -> (i32, i32) {
    %c0_i32 = arith.constant 0 : i32
    %c0_i32_0 = arith.constant 0 : i32
    %c0_i32_1 = arith.constant 0 : i32
    return %c0_i32, %c0_i32_0 : i32, i32
  }
  func.func @transform_3(%arg0: i32) -> (i32, i32) {
    %c0_i32 = arith.constant 0 : i32
    %c0_i32_0 = arith.constant 0 : i32
    %c0_i32_1 = arith.constant 0 : i32
    return %c0_i32, %c0_i32_0 : i32, i32
  }
  func.func @transform_4(%arg0: i32) -> (i32, i32, i32) {
    %c0_i32 = arith.constant 0 : i32
    %c0_i32_0 = arith.constant 0 : i32
    %c0_i32_1 = arith.constant 0 : i32
    %c0_i32_2 = arith.constant 0 : i32
    return %c0_i32, %c0_i32_0, %c0_i32_1 : i32, i32, i32
  }
  func.func @transform_5(%arg0: i32) -> (i32, i32) {
    %c0_i32 = arith.constant 0 : i32
    %c0_i32_0 = arith.constant 0 : i32
    %c0_i32_1 = arith.constant 0 : i32
    return %c0_i32, %c0_i32_0 : i32, i32
  }
  func.func @transform_6(%arg0: i32) -> (i32, i32, i32) {
    %c0_i32 = arith.constant 0 : i32
    %c0_i32_0 = arith.constant 0 : i32
    %c0_i32_1 = arith.constant 0 : i32
    %c0_i32_2 = arith.constant 0 : i32
    return %c0_i32, %c0_i32_0, %c0_i32_1 : i32, i32, i32
  }
  func.func @transform_7(%arg0: i32) -> (i32, i32) {
    %c0_i32 = arith.constant 0 : i32
    %c0_i32_0 = arith.constant 0 : i32
    %c0_i32_1 = arith.constant 0 : i32
    return %c0_i32, %c0_i32_0 : i32, i32
  }
  func.func @transform_8(%arg0: i32) -> (i32, i32) {
    %c0_i32 = arith.constant 0 : i32
    %c0_i32_0 = arith.constant 0 : i32
    return %arg0, %c0_i32 : i32, i32
  }
}

</mosaic_0001>

<bundles_post_ra>
// kernel: lenet1_forward.1
= control target key start
LH: loop header
LB: loop body
LE: loop exit
PB: predicated region body
PF: predicated region fallthrough
CT: control target
= control target key end

     0   :  { %vm95_vm0 = vcmask 1043456   ;;  %vm76_vm1 = vcmask 97280   ;;  %vm178_vm2 = vcmask 785408   ;;  %vm214_vm3 = vcmask 392192   ;;  %s2966_s1 = inlined_call_operand.vmem [shape: f32[140,96], index: 1, kind: input, shape index: {}]   ;;  %s2967_s0 = inlined_call_operand.vmem [shape: f32[24,8,140], index: 0, kind: input, shape index: {}]   ;;  %s2968_s2 = inlined_call_operand.vmem [shape: f32[1,96], index: 2, kind: input, shape index: {}]   ;;  %s2969_s3 = inlined_call_operand.vmem [shape: f32[96,48], index: 3, kind: input, shape index: {}]   ;;  %s2970_s4 = inlined_call_operand.vmem [shape: f32[5,48,96], index: 4, kind: input, shape index: {}]   ;;  %s2971_s5 = inlined_call_operand.vmem [shape: f32[1,96], index: 5, kind: input, shape index: {}]   ;;  %s2972_s6 = inlined_call_operand.vmem [shape: f32[8,96,128], index: 6, kind: input, shape index: {}]   ;;  %s2973_s7 = inlined_call_operand.vmem [shape: f32[1,128], index: 7, kind: input, shape index: {}]   ;;  %s2974_s8 = inlined_call_operand.vmem [shape: f32[8,128], index: 8, kind: output, shape index: {}]  }
   0x1   :  { %v1840_v0 = vld [vmem:[%s2966_s1 + $0x78] sm:$0xff]  ;;  %v1845_v1 = vld [vmem:[%s2966_s1 + $0x70] sm:$0xff]  ;;  %v1851_v2 = vld [vmem:[%s2966_s1 + $0x68] sm:$0xff] }
   0x2   :  { %99 = vmatpush.msra.mxu0 %v1840_v0  ;;  %v1857_v3 = vld [vmem:[%s2966_s1 + $0x60] sm:$0xff]  ;;  %v1863_v4 = vld [vmem:[%s2966_s1 + $0x88] sm:$0xf]  ;;  %v1868_v5 = vld [vmem:[%s2966_s1 + $0x58] sm:$0xff] }
   0x3   :  { %1485 = vmatpush.msk.msra.mxu1 %vm95_vm0, %v1863_v4  ;;  %v1875_v6 = vld [vmem:[%s2966_s1 + $0x80] sm:$0xff]  ;;  %v62_v7 = vld [vmem:[%s2967_s0 + $0x8] sm:$0xff]  ;;  %1717 = vmatpush.msk.msra.mxu3 %vm95_vm0, %v1863_v4  ;;  %v1886_v8 = vld [vmem:[%s2966_s1 + $0x50] sm:$0xff] }
   0x4   :  { %100 = vmatpush.msra.mxu0 %v1845_v1  ;;  %v1895_v9 = vld [vmem:[%s2966_s1 + $0x48] sm:$0xff]  ;;  %v1902_v10 = vld [vmem:[%s2966_s1 + $0x40] sm:$0xff]  ;;  %v1909_v11 = vld [vmem:[%s2966_s1 + $0x38] sm:$0xff] }
   0x5   :  { %149 = vmatpush.msra.mxu1 %v1875_v6  ;;  %1718 = vmatpush.msra.mxu3 %v1875_v6  ;;  %v64_v12 = vld [vmem:[%s2967_s0 + $0x18] sm:$0xff]  ;;  %v1919_v13 = vld [vmem:[%s2966_s1 + $0x30] sm:$0xff]  ;;  %v1930_v15 = vld [vmem:[%s2966_s1 + $0x28] sm:$0xff] }
   0x6   :  { %101 = vmatpush.msra.mxu0 %v1851_v2  ;;  %1486 = vmatmul.msk.f32.vlgmr.msra.gmra.mxu1 %vm76_vm1, %v62_v7  ;;  %v68_v14 = vld [vmem:[%s2967_s0 + $0x38] sm:$0xff]  ;;  %v1938_v16 = vld [vmem:[%s2966_s1 + $0x20] sm:$0xff]  ;;  %v66_v18 = vld [vmem:[%s2967_s0 + $0x28] sm:$0xff] }
   0x7   :  { %249 = vmatpush.msrb.mxu3 %v1840_v0  ;;  %v1945_v17 = vld [vmem:[%s2966_s1 + $0x18] sm:$0xff]  ;;  %v1955_v19 = vld [vmem:[%s2966_s1 + $0x10] sm:$0xff]  ;;  %v70_v20 = vld [vmem:[%s2967_s0 + $0x48] sm:$0xff] }
   0x8   :  { %102 = vmatpush.msra.mxu0 %v1857_v3  ;;  %1489 = vmatmul.msk.f32.vlgmr.msra.gmra.mxu3 %vm76_vm1, %v68_v14  ;;  %v1965_v21 = vld [vmem:[%s2966_s1 + $0x8] sm:$0xff]  ;;  %v1973_v22 = vld [vmem:[%s2966_s1] sm:$0xff]  ;;  %v72_v24 = vld [vmem:[%s2967_s0 + $0x58] sm:$0xff] }
   0x9   :  { %250 = vmatpush.msrb.mxu3 %v1845_v1  ;;  %v61_v23 = vld [vmem:[%s2967_s0] sm:$0xff]  ;;  %v63_v25 = vld [vmem:[%s2967_s0 + $0x10] sm:$0xff]  ;;  %v2000_v26 = vld [vmem:[%s2969_s3 + $0x58] sm:$0xff] }
   0xa   :  { %103 = vmatpush.msra.mxu0 %v1868_v5  ;;  %192 = vmatpush.msra.mxu2 %v2000_v26  ;;  %v65_v27 = vld [vmem:[%s2967_s0 + $0x20] sm:$0xff]  ;;  %v67_v28 = vld [vmem:[%s2967_s0 + $0x30] sm:$0xff]  ;;  %v2041_v32 = vld [vmem:[%s2969_s3 + $0x48] sm:$0xff] }
   0xb   :  { %251 = vmatpush.msrb.mxu3 %v1851_v2  ;;  %341 = vmatpush.msrb.mxu1 %v2000_v26  ;;  %v69_v29 = vld [vmem:[%s2967_s0 + $0x40] sm:$0xff]  ;;  %v71_v30 = vld [vmem:[%s2967_s0 + $0x50] sm:$0xff]  ;;  %v2056_v34 = vld [vmem:[%s2969_s3 + $0x38] sm:$0xff] }
   0xc   :  { %104 = vmatpush.msra.mxu0 %v1886_v8  ;;  %v2034_v31 = vld [vmem:[%s2969_s3 + $0x50] sm:$0xff]  ;;  %v2049_v33 = vld [vmem:[%s2969_s3 + $0x40] sm:$0xff]  ;;  %v2073_v36 = vld [vmem:[%s2969_s3 + $0x28] sm:$0xff] }
   0xd   :  { %252 = vmatpush.msrb.mxu3 %v1857_v3  ;;  %193 = vmatpush.msra.mxu2 %v2034_v31  ;;  %v2065_v35 = vld [vmem:[%s2969_s3 + $0x30] sm:$0xff]  ;;  %v2081_v37 = vld [vmem:[%s2969_s3 + $0x20] sm:$0xff]  ;;  %v2088_v38 = vld [vmem:[%s2969_s3 + $0x18] sm:$0xff] }
   0xe   :  { %105 = vmatpush.msra.mxu0 %v1895_v9  ;;  %1487 = vmatmul.msk.f32.gmra.mxu1 %vm76_vm1, %v64_v12  ;;  %v2097_v39 = vld [vmem:[%s2969_s3 + $0x10] sm:$0xff]  ;;  %v2105_v40 = vld [vmem:[%s2969_s3 + $0x8] sm:$0xff]  ;;  %v2113_v41 = vld [vmem:[%s2969_s3] sm:$0xff] }
   0xf   :  { %253 = vmatpush.msrb.mxu3 %v1868_v5  ;;  %342 = vmatpush.msrb.mxu1 %v2034_v31  ;;  %v2128_v43 = vld [vmem:[%s2968_s2] ss:$0 sm:$0xff] }
  0x10   :  { %106 = vmatpush.msra.mxu0 %v1902_v10  ;;  %1490 = vmatmul.msk.f32.gmra.mxu3 %vm76_vm1, %v70_v20  ;;  %v1495_v58 = vld [vmem:[%s2967_s0 + $0x60] sm:$0xff] }
  0x11   :  { %254 = vmatpush.msrb.mxu3 %v1886_v8  ;;  %194 = vmatpush.msra.mxu2 %v2041_v32  ;;  %v1517_v20 = vld [vmem:[%s2967_s0 + $0xc0] sm:$0xff] }
  0x12   :  { %107 = vmatpush.msra.mxu0 %v1909_v11  ;;  %343 = vmatpush.msrb.mxu1 %v2041_v32 }
  0x13   :  { %255 = vmatpush.msrb.mxu3 %v1895_v9  ;;  %195 = vmatpush.msra.mxu2 %v2049_v33 }
  0x14   :  { %108 = vmatpush.msra.mxu0 %v1919_v13  ;;  %344 = vmatpush.msrb.mxu1 %v2049_v33 }
  0x15   :  { %256 = vmatpush.msrb.mxu3 %v1902_v10  ;;  %196 = vmatpush.msra.mxu2 %v2056_v34 }
  0x16   :  { %109 = vmatpush.msra.mxu0 %v1930_v15  ;;  %1488 = vmatmul.msk.f32.gmra.mxu1 %vm76_vm1, %v66_v18 }
  0x17   :  { %257 = vmatpush.msrb.mxu3 %v1909_v11  ;;  %345 = vmatpush.msrb.mxu1 %v2056_v34 }
  0x18   :  { %110 = vmatpush.msra.mxu0 %v1938_v16  ;;  %1491 = vmatmul.msk.f32.gmra.mxu3 %vm76_vm1, %v72_v24  ;;  %v1521_v24 = vld [vmem:[%s2967_s0 + $0xe0] sm:$0xff] }
  0x19   :  { %258 = vmatpush.msrb.mxu3 %v1919_v13  ;;  %197 = vmatpush.msra.mxu2 %v2065_v35 }
  0x1a   :  { %111 = vmatpush.msra.mxu0 %v1945_v17  ;;  %346 = vmatpush.msrb.mxu1 %v2065_v35 }
  0x1b   :  { %259 = vmatpush.msrb.mxu3 %v1930_v15  ;;  %198 = vmatpush.msra.mxu2 %v2073_v36 }
  0x1c   :  { %112 = vmatpush.msra.mxu0 %v1955_v19  ;;  %347 = vmatpush.msrb.mxu1 %v2073_v36 }
  0x1d   :  { %260 = vmatpush.msrb.mxu3 %v1938_v16  ;;  %199 = vmatpush.msra.mxu2 %v2081_v37 }
  0x1e   :  { %113 = vmatpush.msra.mxu0 %v1965_v21  ;;  %348 = vmatpush.msrb.mxu1 %v2081_v37 }
  0x1f   :  { %261 = vmatpush.msrb.mxu3 %v1945_v17  ;;  %200 = vmatpush.msra.mxu2 %v2088_v38 }
  0x20   :  { %114 = vmatpush.msra.mxu0 %v1973_v22  ;;  %349 = vmatpush.msrb.mxu1 %v2088_v38 }
  0x21   :  { %115 = vmatmul.f32.vlgmr.msra.gmra.mxu0 %v61_v23  ;;  %262 = vmatpush.msrb.mxu3 %v1955_v19  ;;  %v1502_v23 = vld [vmem:[%s2967_s0 + $0x98] sm:$0xff] }
  0x22   :  { %398 = vmatpush.msrb.mxu0 %v1840_v0  ;;  %201 = vmatpush.msra.mxu2 %v2097_v39 }
  0x23   :  { %263 = vmatpush.msrb.mxu3 %v1965_v21  ;;  %350 = vmatpush.msrb.mxu1 %v2097_v39 }
  0x24   :  { %399 = vmatpush.msrb.mxu0 %v1845_v1  ;;  %202 = vmatpush.msra.mxu2 %v2105_v40 }
  0x25   :  { %264 = vmatpush.msrb.mxu3 %v1973_v22  ;;  %351 = vmatpush.msrb.mxu1 %v2105_v40 }
  0x26   :  { %400 = vmatpush.msrb.mxu0 %v1851_v2  ;;  %203 = vmatpush.msra.mxu2 %v2113_v41 }
  0x27   :  { %490 = vmatpush.msra.mxu3 %v2000_v26  ;;  %352 = vmatpush.msrb.mxu1 %v2113_v41 }
  0x28   :  { %401 = vmatpush.msrb.mxu0 %v1857_v3  ;;  %1507 = vmatpush.msk.msrb.mxu2 %vm95_vm0, %v1863_v4 }
  0x29   :  { %118 = vmatmul.f32.gmra.mxu0 %v63_v25  ;;  %491 = vmatpush.msra.mxu3 %v2034_v31  ;;  %v1504_v25 = vld [vmem:[%s2967_s0 + $0xa8] sm:$0xff] }
  0x2a   :  { %402 = vmatpush.msrb.mxu0 %v1868_v5  ;;  %1529 = vmatpush.msk.msra.mxu1 %vm95_vm0, %v1863_v4 }
  0x2b   :  { %492 = vmatpush.msra.mxu3 %v2041_v32  ;;  %299 = vmatpush.msrb.mxu2 %v1875_v6 }
  0x2c   :  { %403 = vmatpush.msrb.mxu0 %v1886_v8  ;;  %448 = vmatpush.msra.mxu1 %v1875_v6 }
  0x2d   :  { %493 = vmatpush.msra.mxu3 %v2049_v33 }
  0x2e   :  { %404 = vmatpush.msrb.mxu0 %v1895_v9  ;;  %265 = vmatmul.f32.vlgmr.msrb.gmra.mxu3 %v1495_v58  ;;  %v2294_v58 = vld [vmem:[%s2970_s4 + $0x30] sm:$0xff] }
  0x2f   :  { %494 = vmatpush.msra.mxu3 %v2056_v34 }
  0x30   :  { %405 = vmatpush.msrb.mxu0 %v1902_v10 }
  0x31   :  { %121 = vmatmul.f32.gmra.mxu0 %v65_v27  ;;  %495 = vmatpush.msra.mxu3 %v2065_v35  ;;  %v1506_v27 = vld [vmem:[%s2967_s0 + $0xb8] sm:$0xff] }
  0x32   :  { %406 = vmatpush.msrb.mxu0 %v1909_v11 }
  0x33   :  { %496 = vmatpush.msra.mxu3 %v2073_v36 }
  0x34   :  { %407 = vmatpush.msrb.mxu0 %v1919_v13 }
  0x35   :  { %497 = vmatpush.msra.mxu3 %v2081_v37 }
  0x36   :  { %408 = vmatpush.msrb.mxu0 %v1930_v15 }
  0x37   :  { %498 = vmatpush.msra.mxu3 %v2088_v38 }
  0x38   :  { %409 = vmatpush.msrb.mxu0 %v1938_v16 }
  0x39   :  { %124 = vmatmul.f32.gmra.mxu0 %v67_v28  ;;  %499 = vmatpush.msra.mxu3 %v2097_v39  ;;  %v1539_v28 = vld [vmem:[%s2967_s0 + $0x120] sm:$0xff] }
  0x3a   :  { %410 = vmatpush.msrb.mxu0 %v1945_v17 }
  0x3b   :  { %500 = vmatpush.msra.mxu3 %v2105_v40 }
  0x3c   :  { %411 = vmatpush.msrb.mxu0 %v1955_v19 }
  0x3d   :  { %501 = vmatpush.msra.mxu3 %v2113_v41 }
  0x3e   :  { %412 = vmatpush.msrb.mxu0 %v1965_v21 }
  0x3f   :  { %1551 = vmatpush.msk.msrb.mxu3 %vm95_vm0, %v1863_v4 }
  0x40   :  { %413 = vmatpush.msrb.mxu0 %v1973_v22 }
  0x41   :  { %127 = vmatmul.f32.gmra.mxu0 %v69_v29  ;;  %597 = vmatpush.msrb.mxu3 %v1875_v6  ;;  %v1541_v29 = vld [vmem:[%s2967_s0 + $0x130] sm:$0xff] }
  0x49   :  { %130 = vmatmul.f32.gmra.mxu0 %v71_v30  ;;  %v1523_v30 = vld [vmem:[%s2967_s0 + $0xf0] sm:$0xff] }
  0x51   :  { %414 = vmatmul.f32.vlgmr.msrb.gmra.mxu0 %v1517_v20 }
  0x83   :  { %v151_v42 = vpop.f32.mrf.mxu1 }
  0x8b   :  { %v154_v48 = vpop.f32.mrf.mxu1  ;;  %v160_v56 = vpop.f32.mrf.mxu3 }
  0x93   :  { %v157_v57 = vpop.f32.mrf.mxu1  ;;  %v163_v63 = vpop.f32.mrf.mxu3 }
  0x9b   :  { %v166_v12 = vpop.f32.mrf.mxu3 }
  0x9e   :  { %v116_v44 = vpop.f32.mrf.mxu0 }
  0x9f   :  { %v117_v45 = vadd.f32 %v2128_v43, %v116_v44  ;;  %v1543_v44 = vld [vmem:[%s2967_s0 + $0x140] sm:$0xff] }
  0xa1   :  { %v152_v46 = vadd.f32 %v151_v42, %v117_v45  ;;  %v2221_v42 = vld [vmem:[%s2970_s4 + $0x58] sm:$0xff]  ;;  %v2230_v45 = vld [vmem:[%s2970_s4 + $0x28] sm:$0xff] }
  0xa2   :  { %709 = vmatpush.msra.mxu0 %v2221_v42 }
  0xa3   :  { %1728 = vtanh.f32 %v152_v46  ;;  %v1525_v46 = vld [vmem:[%s2967_s0 + $0x100] sm:$0xff] }
  0xa6   :  { %v119_v47 = vpop.f32.mrf.mxu0 }
  0xa7   :  { %v120_v49 = vadd.f32 %v2128_v43, %v119_v47  ;;  %v1545_v47 = vld [vmem:[%s2967_s0 + $0x150] sm:$0xff] }
  0xa9   :  { %v155_v50 = vadd.f32 %v154_v48, %v120_v49  ;;  %v1729_v52 = vpop.eup %1728  ;;  %v2242_v48 = vld [vmem:[%s2970_s4 + $0x50] sm:$0xff]  ;;  %v2247_v49 = vld [vmem:[%s2970_s4 + $0x20] sm:$0xff] }
  0xaa   :  { %710 = vmatpush.msra.mxu0 %v2242_v48 }
  0xab   :  { %1730 = vtanh.f32 %v155_v50  ;;  %v1527_v50 = vld [vmem:[%s2967_s0 + $0x110] sm:$0xff] }
  0xae   :  { %v122_v51 = vpop.f32.mrf.mxu0 }
  0xaf   :  { %v123_v54 = vadd.f32 %v2128_v43, %v122_v51  ;;  %v2257_v51 = vld [vmem:[%s2970_s4 + $0x48] sm:$0xff] }
  0xb0   :  { %711 = vmatpush.msra.mxu0 %v2257_v51 }
  0xb1   :  { %v1731_v53 = vpop.eup %1730  ;;  %v158_v59 = vadd.f32 %v157_v57, %v123_v54  ;;  %v1547_v54 = vld [vmem:[%s2967_s0 + $0x160] sm:$0xff]  ;;  %v2287_v57 = vld [vmem:[%s2970_s4 + $0x8] sm:$0xff] }
  0xb2   :  { %v175_v55 = vadd.f32 %v1731_v53, %v1729_v52  ;;  %v2262_v52 = vld [vmem:[%s2970_s4 + $0x18] sm:$0xff]  ;;  %v2267_v53 = vld [vmem:[%s2970_s4 + $0x40] sm:$0xff] }
  0xb3   :  { %1732 = vtanh.f32 %v158_v59  ;;  %712 = vmatpush.msra.mxu0 %v2267_v53  ;;  %v2299_v59 = vld [vmem:[%s2970_s4] sm:$0xff] }
  0xb4   :  { %1492 = vmatmul.msk.f32.vlgmr.msra.gmra.mxu2 %vm178_vm2, %v175_v55  ;;  %v2277_v55 = vld [vmem:[%s2970_s4 + $0x10] sm:$0xff] }
  0xb5   :  { %547 = vmatpush.msra.mxu2 %v1840_v0  ;;  %v1497_v0 = vld [vmem:[%s2967_s0 + $0x70] sm:$0xff] }
  0xb6   :  { %v125_v60 = vpop.f32.mrf.mxu0  ;;  %268 = vmatmul.f32.gmra.mxu3 %v1497_v0  ;;  %v266_v0 = vpop.f32.mrf.mxu3 }
  0xb7   :  { %v126_v61 = vadd.f32 %v2128_v43, %v125_v60  ;;  %548 = vmatpush.msra.mxu2 %v1845_v1  ;;  %v1549_v60 = vld [vmem:[%s2967_s0 + $0x170] sm:$0xff] }
  0xb9   :  { %v161_v62 = vadd.f32 %v160_v56, %v126_v61  ;;  %549 = vmatpush.msra.mxu2 %v1851_v2  ;;  %v1733_v1 = vpop.eup %1732  ;;  %v2282_v56 = vld [vmem:[%s2970_s4 + $0x38] sm:$0xff] }
  0xba   :  { %713 = vmatpush.msra.mxu0 %v2282_v56 }
  0xbb   :  { %1734 = vtanh.f32 %v161_v62  ;;  %550 = vmatpush.msra.mxu2 %v1857_v3  ;;  %v1499_v3 = vld [vmem:[%s2967_s0 + $0x80] sm:$0xff] }
  0xbc   :  { %714 = vmatpush.msra.mxu0 %v2294_v58 }
  0xbd   :  { %551 = vmatpush.msra.mxu2 %v1868_v5 }
  0xbe   :  { %v128_v4 = vpop.f32.mrf.mxu0  ;;  %271 = vmatmul.f32.gmra.mxu3 %v1499_v3 }
  0xbf   :  { %552 = vmatpush.msra.mxu2 %v1886_v8  ;;  %v129_v2 = vadd.f32 %v2128_v43, %v128_v4 }
  0xc1   :  { %v1735_v6 = vpop.eup %1734  ;;  %553 = vmatpush.msra.mxu2 %v1895_v9  ;;  %v164_v5 = vadd.f32 %v163_v63, %v129_v2 }
  0xc2   :  { %v176_v7 = vadd.f32 %v1735_v6, %v1733_v1 }
  0xc3   :  { %554 = vmatpush.msra.mxu2 %v1902_v10  ;;  %1736 = vtanh.f32 %v164_v5  ;;  %v1501_v10 = vld [vmem:[%s2967_s0 + $0x90] sm:$0xff] }
  0xc4   :  { %1493 = vmatmul.msk.f32.gmra.mxu2 %vm178_vm2, %v176_v7  ;;  %v267_v7 = vadd.f32 %v2128_v43, %v266_v0 }
  0xc5   :  { %555 = vmatpush.msra.mxu2 %v1909_v11 }
  0xc6   :  { %v131_v8 = vpop.f32.mrf.mxu0  ;;  %274 = vmatmul.f32.gmra.mxu3 %v1501_v10 }
  0xc7   :  { %v132_v14 = vadd.f32 %v2128_v43, %v131_v8  ;;  %556 = vmatpush.msra.mxu2 %v1919_v13 }
  0xc9   :  { %v167_v9 = vadd.f32 %v166_v12, %v132_v14  ;;  %557 = vmatpush.msra.mxu2 %v1930_v15  ;;  %v1737_v11 = vpop.eup %1736  ;;  %v1503_v15 = vld [vmem:[%s2967_s0 + $0xa0] sm:$0xff] }
  0xcb   :  { %1738 = vtanh.f32 %v167_v9  ;;  %558 = vmatpush.msra.mxu2 %v1938_v16  ;;  %v1496_v16 = vld [vmem:[%s2967_s0 + $0x68] sm:$0xff] }
  0xcd   :  { %559 = vmatpush.msra.mxu2 %v1945_v17  ;;  %v1505_v17 = vld [vmem:[%s2967_s0 + $0xb0] sm:$0xff] }
  0xce   :  { %277 = vmatmul.f32.gmra.mxu3 %v1503_v15  ;;  %v415_v0 = vpop.f32.mrf.mxu0 }
  0xcf   :  { %560 = vmatpush.msra.mxu2 %v1955_v19  ;;  %v1498_v19 = vld [vmem:[%s2967_s0 + $0x78] sm:$0xff] }
  0xd1   :  { %v1739_v18 = vpop.eup %1738  ;;  %561 = vmatpush.msra.mxu2 %v1965_v21  ;;  %v1500_v21 = vld [vmem:[%s2967_s0 + $0x88] sm:$0xff] }
  0xd2   :  { %v177_v13 = vadd.f32 %v1739_v18, %v1737_v11 }
  0xd3   :  { %562 = vmatpush.msra.mxu2 %v1973_v22  ;;  %v1519_v22 = vld [vmem:[%s2967_s0 + $0xd0] sm:$0xff] }
  0xd4   :  { %1494 = vmatmul.msk.f32.gmra.mxu2 %vm178_vm2, %v177_v13  ;;  %417 = vmatmul.f32.gmra.mxu0 %v1519_v22 }
  0xd6   :  { %280 = vmatmul.f32.gmra.mxu3 %v1505_v17 }
  0xdc   :  { %1508 = vmatmul.msk.f32.vlgmr.msrb.gmra.mxu2 %vm76_vm1, %v1496_v16  ;;  %420 = vmatmul.f32.gmra.mxu0 %v1521_v24 }
  0xdd   :  { %1719 = vmatpush.msrb.mxu2 %v2230_v45 }
  0xdf   :  { %1720 = vmatpush.msrb.mxu2 %v2247_v49 }
  0xe1   :  { %1721 = vmatpush.msrb.mxu2 %v2262_v52 }
  0xe3   :  { %1722 = vmatpush.msrb.mxu2 %v2277_v55 }
  0xe4   :  { %1509 = vmatmul.msk.f32.gmra.mxu2 %vm76_vm1, %v1498_v19  ;;  %423 = vmatmul.f32.gmra.mxu0 %v1523_v30  ;;  %v2373_v30 = vld [vmem:[%s2970_s4 + $0xe8] sm:$0xff] }
  0xe5   :  { %1723 = vmatpush.msrb.mxu2 %v2287_v57  ;;  %916 = vmatpush.msrb.mxu0 %v2373_v30 }
  0xe7   :  { %1724 = vmatpush.msrb.mxu2 %v2299_v59 }
  0xec   :  { %1510 = vmatmul.msk.f32.gmra.mxu2 %vm76_vm1, %v1500_v21  ;;  %426 = vmatmul.f32.gmra.mxu0 %v1525_v46  ;;  %v2385_v46 = vld [vmem:[%s2970_s4 + $0xd8] sm:$0xff] }
  0xf4   :  { %1511 = vmatmul.msk.f32.gmra.mxu2 %vm76_vm1, %v1502_v23  ;;  %429 = vmatmul.f32.gmra.mxu0 %v1527_v50  ;;  %v2396_v50 = vld [vmem:[%s2970_s4 + $0xc8] sm:$0xff] }
  0xfc   :  { %1512 = vmatmul.msk.f32.gmra.mxu2 %vm76_vm1, %v1504_v25 }
 0x104   :  { %1513 = vmatmul.msk.f32.gmra.mxu2 %vm76_vm1, %v1506_v27 }
 0x10c   :  { %563 = vmatmul.f32.vlgmr.msra.gmra.mxu2 %v1539_v28  ;;  %v1526_v28 = vld [vmem:[%s2967_s0 + $0x108] sm:$0xff] }
 0x114   :  { %566 = vmatmul.f32.gmra.mxu2 %v1541_v29  ;;  %v1528_v29 = vld [vmem:[%s2967_s0 + $0x118] sm:$0xff] }
 0x11c   :  { %569 = vmatmul.f32.gmra.mxu2 %v1543_v44  ;;  %v2378_v44 = vld [vmem:[%s2970_s4 + $0xe0] sm:$0xff] }
 0x11d   :  { %917 = vmatpush.msrb.mxu0 %v2378_v44 }
 0x11f   :  { %918 = vmatpush.msrb.mxu0 %v2385_v46 }
 0x124   :  { %572 = vmatmul.f32.gmra.mxu2 %v1545_v47  ;;  %v2390_v47 = vld [vmem:[%s2970_s4 + $0xd0] sm:$0xff] }
 0x125   :  { %919 = vmatpush.msrb.mxu0 %v2390_v47 }
 0x127   :  { %920 = vmatpush.msrb.mxu0 %v2396_v50 }
 0x12c   :  { %575 = vmatmul.f32.gmra.mxu2 %v1547_v54  ;;  %v2403_v54 = vld [vmem:[%s2970_s4 + $0xc0] sm:$0xff] }
 0x12d   :  { %921 = vmatpush.msrb.mxu0 %v2403_v54 }
 0x134   :  { %578 = vmatmul.f32.gmra.mxu2 %v1549_v60 }
 0x137   :  { %v205_v61 = vpop.f32.mrf.mxu2 }
 0x138   :  { %215 = vst.msk [vmem:[#allocation2] sm:$0xff] %vm214_vm3, %v205_v61 }
 0x139   :  { %v269_v1 = vpop.f32.mrf.mxu3 }
 0x13a   :  { %v270_v5 = vadd.f32 %v2128_v43, %v269_v1 }
 0x141   :  { %v272_v3 = vpop.f32.mrf.mxu3 }
 0x142   :  { %v273_v13 = vadd.f32 %v2128_v43, %v272_v3  ;;  %v416_v3 = vadd.f32 %v2128_v43, %v415_v0  ;;  %v2474_v0 = vld [vmem:[%s2970_s4 + $0x90] sm:$0xff] }
 0x147   :  { %v208_v62 = vpop.f32.mrf.mxu2 }
 0x148   :  { %216 = vst.msk [vmem:[#allocation2 + $0x8] sm:$0xff] %vm214_vm3, %v208_v62 }
 0x149   :  { %v275_v9 = vpop.f32.mrf.mxu3 }
 0x14a   :  { %v276_v16 = vadd.f32 %v2128_v43, %v275_v9 }
 0x14f   :  { %v676_v63 = vld [vmem:[#allocation2 + $0x8] sm:$0xff] }
 0x150   :  { %1567 = vmatmul.msk.f32.vlgmr.msra.gmra.mxu0 %vm214_vm3, %v676_v63  ;;  %1572 = vmatmul.msk.f32.vlgmr.msrb.gmra.mxu2 %vm214_vm3, %v676_v63 }
 0x151   :  { %v278_v20 = vpop.f32.mrf.mxu3  ;;  %v418_v1 = vpop.f32.mrf.mxu0 }
 0x157   :  { %v211_v4 = vpop.f32.mrf.mxu2 }
 0x158   :  { %217 = vst.msk [vmem:[#allocation2 + $0x10] sm:$0xff] %vm214_vm3, %v211_v4 }
 0x159   :  { %v281_v25 = vpop.f32.mrf.mxu3 }
 0x15f   :  { %v301_v6 = vpop.f32.mrf.mxu2  ;;  %v2313_v2 = vld [vmem:[#allocation2 + $0x10] sm:$0xff] }
 0x160   :  { %1568 = vmatmul.msk.f32.gmra.mxu0 %vm214_vm3, %v2313_v2  ;;  %1573 = vmatmul.msk.f32.gmra.mxu2 %vm214_vm3, %v2313_v2  ;;  %v302_v8 = vadd.f32 %v301_v6, %v267_v7 }
 0x162   :  { %1740 = vtanh.f32 %v302_v8  ;;  %v421_v8 = vpop.f32.mrf.mxu0 }
 0x167   :  { %v304_v12 = vpop.f32.mrf.mxu2 }
 0x168   :  { %v305_v14 = vadd.f32 %v304_v12, %v270_v5  ;;  %v1741_v10 = vpop.eup %1740  ;;  %v419_v5 = vadd.f32 %v2128_v43, %v418_v1  ;;  %v1546_v1 = vld [vmem:[%s2967_s0 + $0x158] sm:$0xff] }
 0x16a   :  { %1742 = vtanh.f32 %v305_v14 }
 0x16f   :  { %v307_v11 = vpop.f32.mrf.mxu2 }
 0x170   :  { %v1743_v18 = vpop.eup %1742  ;;  %v308_v17 = vadd.f32 %v307_v11, %v273_v13  ;;  %v424_v11 = vpop.f32.mrf.mxu0 }
 0x171   :  { %v325_v15 = vadd.f32 %v1743_v18, %v1741_v10 }
 0x172   :  { %1744 = vtanh.f32 %v308_v17  ;;  %v425_v17 = vadd.f32 %v2128_v43, %v424_v11 }
 0x173   :  { %1514 = vmatmul.msk.f32.vlgmr.msrb.gmra.mxu1 %vm178_vm2, %v325_v15  ;;  %v422_v15 = vadd.f32 %v2128_v43, %v421_v8 }
 0x174   :  { %639 = vmatpush.msrb.mxu1 %v2000_v26  ;;  %v279_v26 = vadd.f32 %v2128_v43, %v278_v20 }
 0x176   :  { %640 = vmatpush.msrb.mxu1 %v2034_v31 }
 0x177   :  { %v310_v19 = vpop.f32.mrf.mxu2 }
 0x178   :  { %v311_v21 = vadd.f32 %v310_v19, %v276_v16  ;;  %641 = vmatpush.msrb.mxu1 %v2041_v32  ;;  %v1745_v22 = vpop.eup %1744  ;;  %v282_v32 = vadd.f32 %v2128_v43, %v281_v25 }
 0x17a   :  { %1746 = vtanh.f32 %v311_v21  ;;  %642 = vmatpush.msrb.mxu1 %v2049_v33 }
 0x17c   :  { %643 = vmatpush.msrb.mxu1 %v2056_v34 }
 0x17e   :  { %644 = vmatpush.msrb.mxu1 %v2065_v35 }
 0x17f   :  { %v313_v23 = vpop.f32.mrf.mxu2 }
 0x180   :  { %v1747_v24 = vpop.eup %1746  ;;  %645 = vmatpush.msrb.mxu1 %v2073_v36  ;;  %v314_v33 = vadd.f32 %v313_v23, %v279_v26 }
 0x181   :  { %v326_v31 = vadd.f32 %v1747_v24, %v1745_v22  ;;  %v427_v22 = vpop.f32.mrf.mxu0 }
 0x182   :  { %646 = vmatpush.msrb.mxu1 %v2081_v37  ;;  %1748 = vtanh.f32 %v314_v33 }
 0x183   :  { %1515 = vmatmul.msk.f32.gmra.mxu1 %vm178_vm2, %v326_v31  ;;  %v428_v31 = vadd.f32 %v2128_v43, %v427_v22 }
 0x184   :  { %647 = vmatpush.msrb.mxu1 %v2088_v38  ;;  %v1518_v38 = vld [vmem:[%s2967_s0 + $0xc8] sm:$0xff] }
 0x186   :  { %648 = vmatpush.msrb.mxu1 %v2097_v39  ;;  %v1520_v39 = vld [vmem:[%s2967_s0 + $0xd8] sm:$0xff] }
 0x187   :  { %v316_v34 = vpop.f32.mrf.mxu2 }
 0x188   :  { %v317_v35 = vadd.f32 %v316_v34, %v282_v32  ;;  %649 = vmatpush.msrb.mxu1 %v2105_v40  ;;  %v1749_v36 = vpop.eup %1748  ;;  %v1522_v40 = vld [vmem:[%s2967_s0 + $0xe8] sm:$0xff] }
 0x189   :  { %v430_v32 = vpop.f32.mrf.mxu0 }
 0x18a   :  { %1750 = vtanh.f32 %v317_v35  ;;  %650 = vmatpush.msrb.mxu1 %v2113_v41  ;;  %v1524_v41 = vld [vmem:[%s2967_s0 + $0xf8] sm:$0xff]  ;;  %v431_v33 = vadd.f32 %v2128_v43, %v430_v32 }
 0x190   :  { %v1751_v27 = vpop.eup %1750 }
 0x191   :  { %v327_v37 = vadd.f32 %v1751_v27, %v1749_v36 }
 0x193   :  { %1516 = vmatmul.msk.f32.gmra.mxu1 %vm178_vm2, %v327_v37 }
 0x19b   :  { %1530 = vmatmul.msk.f32.vlgmr.msra.gmra.mxu1 %vm76_vm1, %v1518_v38 }
 0x19c   :  { %750 = vmatpush.msra.mxu1 %v2230_v45 }
 0x19e   :  { %751 = vmatpush.msra.mxu1 %v2247_v49 }
 0x1a0   :  { %752 = vmatpush.msra.mxu1 %v2262_v52 }
 0x1a2   :  { %753 = vmatpush.msra.mxu1 %v2277_v55 }
 0x1a3   :  { %1531 = vmatmul.msk.f32.gmra.mxu1 %vm76_vm1, %v1520_v39  ;;  %v1540_v39 = vld [vmem:[%s2967_s0 + $0x128] sm:$0xff] }
 0x1a4   :  { %754 = vmatpush.msra.mxu1 %v2287_v57 }
 0x1a6   :  { %755 = vmatpush.msra.mxu1 %v2299_v59 }
 0x1ab   :  { %1532 = vmatmul.msk.f32.gmra.mxu1 %vm76_vm1, %v1522_v40  ;;  %v2441_v40 = vld [vmem:[%s2970_s4 + $0xb8] sm:$0xff] }
 0x1b3   :  { %1533 = vmatmul.msk.f32.gmra.mxu1 %vm76_vm1, %v1524_v41  ;;  %v2446_v41 = vld [vmem:[%s2970_s4 + $0xb0] sm:$0xff] }
 0x1bb   :  { %1534 = vmatmul.msk.f32.gmra.mxu1 %vm76_vm1, %v1526_v28  ;;  %v1542_v28 = vld [vmem:[%s2967_s0 + $0x138] sm:$0xff] }
 0x1c3   :  { %1535 = vmatmul.msk.f32.gmra.mxu1 %vm76_vm1, %v1528_v29  ;;  %v2457_v29 = vld [vmem:[%s2970_s4 + $0xa8] sm:$0xff] }
 0x1f0   :  { %v354_v60 = vpop.f32.mrf.mxu1 }
 0x1f1   :  { %364 = vst.msk [vmem:[#allocation2 + $0x18] sm:$0xff] %vm214_vm3, %v354_v60  ;;  %v2462_v60 = vld [vmem:[%s2970_s4 + $0xa0] sm:$0xff] }
 0x1f8   :  { %v2407_v61 = vld [vmem:[#allocation2 + $0x18] sm:$0xff] }
 0x1f9   :  { %1569 = vmatmul.msk.f32.gmra.mxu0 %vm214_vm3, %v2407_v61  ;;  %1574 = vmatmul.msk.f32.gmra.mxu2 %vm214_vm3, %v2407_v61 }
 0x200   :  { %v357_v62 = vpop.f32.mrf.mxu1 }
 0x201   :  { %365 = vst.msk [vmem:[#allocation2 + $0x20] sm:$0xff] %vm214_vm3, %v357_v62  ;;  %v2468_v62 = vld [vmem:[%s2970_s4 + $0x98] sm:$0xff] }
 0x208   :  { %v2414_v63 = vld [vmem:[#allocation2 + $0x20] sm:$0xff] }
 0x209   :  { %1570 = vmatmul.msk.f32.gmra.mxu0 %vm214_vm3, %v2414_v63 }
 0x210   :  { %v360_v4 = vpop.f32.mrf.mxu1 }
 0x211   :  { %366 = vst.msk [vmem:[#allocation2 + $0x28] sm:$0xff] %vm214_vm3, %v360_v4  ;;  %1601 = vmatmul.msk.f32.vlgmr.msrb.gmra.mxu0 %vm214_vm3, %v2414_v63  ;;  %v1544_v4 = vld [vmem:[%s2967_s0 + $0x148] sm:$0xff] }
 0x218   :  { %v450_v6 = vpop.f32.mrf.mxu1  ;;  %v2421_v7 = vld [vmem:[#allocation2 + $0x28] sm:$0xff] }
 0x219   :  { %1602 = vmatmul.msk.f32.gmra.mxu0 %vm214_vm3, %v2421_v7  ;;  %v451_v12 = vadd.f32 %v450_v6, %v416_v3  ;;  %v1548_v6 = vld [vmem:[%s2967_s0 + $0x168] sm:$0xff]  ;;  %v1550_v3 = vld [vmem:[%s2967_s0 + $0x178] sm:$0xff] }
 0x21b   :  { %1752 = vtanh.f32 %v451_v12 }
 0x220   :  { %v453_v14 = vpop.f32.mrf.mxu1 }
 0x221   :  { %v454_v9 = vadd.f32 %v453_v14, %v419_v5  ;;  %v1753_v10 = vpop.eup %1752 }
 0x223   :  { %1754 = vtanh.f32 %v454_v9  ;;  %v564_v9 = vpop.f32.mrf.mxu2 }
 0x228   :  { %v456_v18 = vpop.f32.mrf.mxu1 }
 0x229   :  { %v1755_v13 = vpop.eup %1754  ;;  %v457_v19 = vadd.f32 %v456_v18, %v422_v15 }
 0x22a   :  { %v474_v16 = vadd.f32 %v1755_v13, %v1753_v10  ;;  %v565_v13 = vadd.f32 %v2128_v43, %v564_v9 }
 0x22b   :  { %1756 = vtanh.f32 %v457_v19  ;;  %v567_v11 = vpop.f32.mrf.mxu2 }
 0x22c   :  { %1536 = vmatmul.msk.f32.vlgmr.msra.gmra.mxu3 %vm178_vm2, %v474_v16  ;;  %v568_v15 = vadd.f32 %v2128_v43, %v567_v11 }
 0x22d   :  { %859 = vmatpush.msra.mxu3 %v2441_v40 }
 0x22f   :  { %860 = vmatpush.msra.mxu3 %v2446_v41 }
 0x230   :  { %v459_v20 = vpop.f32.mrf.mxu1 }
 0x231   :  { %v460_v21 = vadd.f32 %v459_v20, %v425_v17  ;;  %v1757_v23 = vpop.eup %1756  ;;  %861 = vmatpush.msra.mxu3 %v2457_v29 }
 0x233   :  { %1758 = vtanh.f32 %v460_v21  ;;  %862 = vmatpush.msra.mxu3 %v2462_v60  ;;  %v570_v16 = vpop.f32.mrf.mxu2 }
 0x235   :  { %863 = vmatpush.msra.mxu3 %v2468_v62 }
 0x237   :  { %864 = vmatpush.msra.mxu3 %v2474_v0 }
 0x238   :  { %v462_v24 = vpop.f32.mrf.mxu1 }
 0x239   :  { %v1759_v26 = vpop.eup %1758  ;;  %v463_v34 = vadd.f32 %v462_v24, %v428_v31 }
 0x23a   :  { %v475_v25 = vadd.f32 %v1759_v26, %v1757_v23  ;;  %v571_v26 = vadd.f32 %v2128_v43, %v570_v16 }
 0x23b   :  { %1760 = vtanh.f32 %v463_v34  ;;  %v573_v22 = vpop.f32.mrf.mxu2  ;;  %v2521_v34 = vld [vmem:[%s2970_s4 + $0x88] sm:$0xff] }
 0x23c   :  { %1537 = vmatmul.msk.f32.gmra.mxu3 %vm178_vm2, %v475_v25  ;;  %v574_v25 = vadd.f32 %v2128_v43, %v573_v22  ;;  %v957_v22 = vld [vmem:[%s2972_s6 + $0x38] sm:$0xff] }
 0x240   :  { %v465_v35 = vpop.f32.mrf.mxu1 }
 0x241   :  { %v466_v36 = vadd.f32 %v465_v35, %v431_v33  ;;  %v1761_v27 = vpop.eup %1760  ;;  %v2526_v35 = vld [vmem:[%s2970_s4 + $0x80] sm:$0xff] }
 0x243   :  { %1762 = vtanh.f32 %v466_v36 }
 0x249   :  { %v1763_v37 = vpop.eup %1762 }
 0x24a   :  { %v476_v38 = vadd.f32 %v1763_v37, %v1761_v27  ;;  %v576_v27 = vpop.f32.mrf.mxu2  ;;  %v2533_v37 = vld [vmem:[%s2970_s4 + $0x78] sm:$0xff] }
 0x24c   :  { %1538 = vmatmul.msk.f32.gmra.mxu3 %vm178_vm2, %v476_v38  ;;  %v2538_v38 = vld [vmem:[%s2970_s4 + $0x70] sm:$0xff] }
 0x254   :  { %1552 = vmatmul.msk.f32.vlgmr.msrb.gmra.mxu3 %vm76_vm1, %v1540_v39 }
 0x25c   :  { %1553 = vmatmul.msk.f32.gmra.mxu3 %vm76_vm1, %v1542_v28 }
 0x264   :  { %1554 = vmatmul.msk.f32.gmra.mxu3 %vm76_vm1, %v1544_v4  ;;  %v2545_v4 = vld [vmem:[%s2970_s4 + $0x68] sm:$0xff] }
 0x26c   :  { %1555 = vmatmul.msk.f32.gmra.mxu3 %vm76_vm1, %v1546_v1  ;;  %v2550_v1 = vld [vmem:[%s2970_s4 + $0x60] sm:$0xff] }
 0x274   :  { %1556 = vmatmul.msk.f32.gmra.mxu3 %vm76_vm1, %v1548_v6 }
 0x27c   :  { %1557 = vmatmul.msk.f32.gmra.mxu3 %vm76_vm1, %v1550_v3  ;;  %v577_v3 = vadd.f32 %v2128_v43, %v576_v27  ;;  %v1612_v27 = vld [vmem:[%s2972_s6 + $0x98] sm:$0xff] }
 0x284   :  { %1591 = vmatmul.msk.f32.vlgmr.msra.gmra.mxu3 %vm214_vm3, %v2407_v61 }
 0x28c   :  { %1592 = vmatmul.msk.f32.gmra.mxu3 %vm214_vm3, %v2414_v63 }
 0x294   :  { %1593 = vmatmul.msk.f32.gmra.mxu3 %vm214_vm3, %v2421_v7 }
 0x2af   :  { %v503_v5 = vpop.f32.mrf.mxu3 }
 0x2b0   :  { %513 = vst.msk [vmem:[#allocation2 + $0x30] sm:$0xff] %vm214_vm3, %v503_v5 }
 0x2b7   :  { %v2501_v8 = vld [vmem:[#allocation2 + $0x30] sm:$0xff] }
 0x2b8   :  { %1594 = vmatmul.msk.f32.gmra.mxu3 %vm214_vm3, %v2501_v8  ;;  %1603 = vmatmul.msk.f32.gmra.mxu0 %vm214_vm3, %v2501_v8 }
 0x2bf   :  { %v506_v12 = vpop.f32.mrf.mxu3 }
 0x2c0   :  { %514 = vst.msk [vmem:[#allocation2 + $0x38] sm:$0xff] %vm214_vm3, %v506_v12  ;;  %v579_v12 = vpop.f32.mrf.mxu2 }
 0x2c1   :  { %v580_v9 = vadd.f32 %v2128_v43, %v579_v12 }
 0x2c7   :  { %v2508_v14 = vld [vmem:[#allocation2 + $0x38] sm:$0xff] }
 0x2c8   :  { %1604 = vmatmul.msk.f32.gmra.mxu0 %vm214_vm3, %v2508_v14 }
 0x2cf   :  { %v509_v10 = vpop.f32.mrf.mxu3 }
 0x2d0   :  { %515 = vst.msk [vmem:[#allocation2 + $0x40] sm:$0xff] %vm214_vm3, %v509_v10 }
 0x2d7   :  { %v599_v18 = vpop.f32.mrf.mxu3 }
 0x2d8   :  { %v600_v17 = vadd.f32 %v599_v18, %v565_v13 }
 0x2da   :  { %1764 = vtanh.f32 %v600_v17  ;;  %v665_v17 = vld [vmem:[#allocation2] sm:$0xff] }
 0x2df   :  { %v602_v19 = vpop.f32.mrf.mxu3 }
 0x2e0   :  { %v603_v20 = vadd.f32 %v602_v19, %v568_v15  ;;  %v1765_v21 = vpop.eup %1764  ;;  %v961_v19 = vld [vmem:[%s2972_s6 + $0x58] sm:$0xff] }
 0x2e2   :  { %1766 = vtanh.f32 %v603_v20  ;;  %v958_v20 = vld [vmem:[%s2972_s6 + $0x40] sm:$0xff] }
 0x2e7   :  { %v605_v23 = vpop.f32.mrf.mxu3 }
 0x2e8   :  { %v1767_v24 = vpop.eup %1766  ;;  %v606_v32 = vadd.f32 %v605_v23, %v571_v26  ;;  %v1615_v23 = vld [vmem:[%s2972_s6 + $0xb0] sm:$0xff]  ;;  %v2592_v26 = vpop.f32.mrf.mxu0 }
 0x2e9   :  { %v623_v31 = vadd.f32 %v1767_v24, %v1765_v21  ;;  %v1616_v21 = vld [vmem:[%s2972_s6 + $0xb8] sm:$0xff]  ;;  %v956_v24 = vld [vmem:[%s2972_s6 + $0x30] sm:$0xff] }
 0x2ea   :  { %1768 = vtanh.f32 %v606_v32  ;;  %982 = vmatpush.msra.mxu2 %v1616_v21  ;;  %v955_v32 = vld [vmem:[%s2972_s6 + $0x28] sm:$0xff] }
 0x2eb   :  { %1558 = vmatmul.msk.f32.vlgmr.msrb.gmra.mxu1 %vm178_vm2, %v623_v31  ;;  %v1624_v21 = vld [vmem:[%s2972_s6 + $0xe8] sm:$0xff] }
 0x2ec   :  { %803 = vmatpush.msrb.mxu1 %v2521_v34  ;;  %983 = vmatpush.msra.mxu2 %v1615_v23  ;;  %v1623_v23 = vld [vmem:[%s2972_s6 + $0xe0] sm:$0xff] }
 0x2ee   :  { %804 = vmatpush.msrb.mxu1 %v2526_v35 }
 0x2ef   :  { %v608_v33 = vpop.f32.mrf.mxu3 }
 0x2f0   :  { %v609_v36 = vadd.f32 %v608_v33, %v574_v25  ;;  %805 = vmatpush.msrb.mxu1 %v2533_v37  ;;  %v1769_v39 = vpop.eup %1768  ;;  %v1614_v25 = vld [vmem:[%s2972_s6 + $0xa8] sm:$0xff]  ;;  %v1613_v33 = vld [vmem:[%s2972_s6 + $0xa0] sm:$0xff]  ;;  %v2625_v12 = vpop.f32.mrf.mxu0 }
 0x2f1   :  { %984 = vmatpush.msra.mxu2 %v1614_v25  ;;  %v1621_v25 = vld [vmem:[%s2972_s6 + $0xd0] sm:$0xff] }
 0x2f2   :  { %1770 = vtanh.f32 %v609_v36  ;;  %806 = vmatpush.msrb.mxu1 %v2538_v38  ;;  %v954_v36 = vld [vmem:[%s2972_s6 + $0x20] sm:$0xff] }
 0x2f3   :  { %985 = vmatpush.msra.mxu2 %v1613_v33 }
 0x2f4   :  { %807 = vmatpush.msrb.mxu1 %v2545_v4 }
 0x2f5   :  { %986 = vmatpush.msra.mxu2 %v1612_v27 }
 0x2f6   :  { %808 = vmatpush.msrb.mxu1 %v2550_v1 }
 0x2f7   :  { %v611_v28 = vpop.f32.mrf.mxu3 }
 0x2f8   :  { %v1771_v6 = vpop.eup %1770  ;;  %v612_v10 = vadd.f32 %v611_v28, %v577_v3  ;;  %v1630_v28 = vld [vmem:[%s2972_s6 + $0x118] sm:$0xff]  ;;  %v952_v3 = vld [vmem:[%s2972_s6 + $0x10] sm:$0xff] }
 0x2f9   :  { %v624_v5 = vadd.f32 %v1771_v6, %v1769_v39  ;;  %v953_v39 = vld [vmem:[%s2972_s6 + $0x18] sm:$0xff]  ;;  %1041 = vmatpush.msrb.mxu3 %v1630_v28  ;;  %v1611_v6 = vld [vmem:[%s2972_s6 + $0x90] sm:$0xff] }
 0x2fa   :  { %1772 = vtanh.f32 %v612_v10  ;;  %987 = vmatpush.msra.mxu2 %v1611_v6  ;;  %v951_v10 = vld [vmem:[%s2972_s6 + $0x8] sm:$0xff] }
 0x2fb   :  { %1559 = vmatmul.msk.f32.gmra.mxu1 %vm178_vm2, %v624_v5  ;;  %v1629_v5 = vld [vmem:[%s2972_s6 + $0x110] sm:$0xff]  ;;  %v1633_v6 = vld [vmem:[%s2972_s6 + $0x128] sm:$0xff] }
 0x2fc   :  { %1042 = vmatpush.msrb.mxu3 %v1629_v5  ;;  %v760_v5 = vpop.f32.mrf.mxu2 }
 0x2ff   :  { %v614_v11 = vpop.f32.mrf.mxu3 }
 0x300   :  { %v615_v18 = vadd.f32 %v614_v11, %v580_v9  ;;  %v1773_v13 = vpop.eup %1772  ;;  %v1610_v9 = vld [vmem:[%s2972_s6 + $0x88] sm:$0xff] }
 0x301   :  { %v1628_v11 = vld [vmem:[%s2972_s6 + $0x108] sm:$0xff]  ;;  %988 = vmatpush.msra.mxu2 %v1610_v9  ;;  %v761_v9 = vadd.f32 %v760_v5, %v2625_v12 }
 0x302   :  { %1774 = vtanh.f32 %v615_v18  ;;  %1043 = vmatpush.msrb.mxu3 %v1628_v11  ;;  %v1609_v18 = vld [vmem:[%s2972_s6 + $0x80] sm:$0xff]  ;;  %v1700_v5 = vld [vmem:[%s2972_s6 + $0x288] sm:$0xff] }
 0x303   :  { %989 = vmatpush.msra.mxu2 %v1609_v18 }
 0x307   :  { %v866_v27 = vpop.f32.mrf.mxu3 }
 0x308   :  { %v1775_v15 = vpop.eup %1774 }
 0x309   :  { %v625_v16 = vadd.f32 %v1775_v15, %v1773_v13  ;;  %v950_v13 = vld [vmem:[%s2972_s6] sm:$0xff] }
 0x30a   :  { %v1627_v15 = vld [vmem:[%s2972_s6 + $0x100] sm:$0xff] }
 0x30b   :  { %1560 = vmatmul.msk.f32.gmra.mxu1 %vm178_vm2, %v625_v16  ;;  %1044 = vmatpush.msrb.mxu3 %v1627_v15  ;;  %v1608_v16 = vld [vmem:[%s2972_s6 + $0x78] sm:$0xff] }
 0x30c   :  { %990 = vmatpush.msra.mxu2 %v1608_v16 }
 0x313   :  { %1571 = vmatmul.msk.f32.vlgmr.msra.gmra.mxu1 %vm214_vm3, %v665_v17  ;;  %v1626_v17 = vld [vmem:[%s2972_s6 + $0xf8] sm:$0xff] }
 0x314   :  { %1005 = vmatpush.msra.mxu1 %v961_v19  ;;  %1045 = vmatpush.msrb.mxu3 %v1626_v17  ;;  %v1625_v19 = vld [vmem:[%s2972_s6 + $0xf0] sm:$0xff] }
 0x316   :  { %1046 = vmatpush.msrb.mxu3 %v1625_v19 }
 0x318   :  { %1047 = vmatpush.msrb.mxu3 %v1624_v21 }
 0x31a   :  { %1048 = vmatpush.msrb.mxu3 %v1623_v23 }
 0x31b   :  { %1581 = vmatmul.msk.f32.vlgmr.msrb.gmra.mxu1 %vm214_vm3, %v2313_v2  ;;  %v960_v2 = vld [vmem:[%s2972_s6 + $0x50] sm:$0xff] }
 0x31c   :  { %1006 = vmatpush.msra.mxu1 %v960_v2  ;;  %v1642_v2 = vld [vmem:[%s2972_s6 + $0x170] sm:$0xff] }
 0x323   :  { %1582 = vmatmul.msk.f32.gmra.mxu1 %vm214_vm3, %v2407_v61  ;;  %v959_v61 = vld [vmem:[%s2972_s6 + $0x48] sm:$0xff] }
 0x324   :  { %1007 = vmatpush.msra.mxu1 %v959_v61  ;;  %v2665_v61 = vpop.f32.mrf.mxu0 }
 0x326   :  { %1008 = vmatpush.msra.mxu1 %v958_v20 }
 0x328   :  { %1009 = vmatpush.msra.mxu1 %v957_v22  ;;  %v1641_v22 = vld [vmem:[%s2972_s6 + $0x168] sm:$0xff] }
 0x32a   :  { %1010 = vmatpush.msra.mxu1 %v956_v24  ;;  %v1640_v24 = vld [vmem:[%s2972_s6 + $0x160] sm:$0xff] }
 0x32b   :  { %1583 = vmatmul.msk.f32.gmra.mxu1 %vm214_vm3, %v2414_v63 }
 0x32c   :  { %1011 = vmatpush.msra.mxu1 %v955_v32  ;;  %v2703_v32 = vpop.f32.mrf.mxu0 }
 0x32e   :  { %1012 = vmatpush.msra.mxu1 %v954_v36  ;;  %v1635_v36 = vld [vmem:[%s2972_s6 + $0x138] sm:$0xff] }
 0x330   :  { %1013 = vmatpush.msra.mxu1 %v953_v39  ;;  %v1634_v39 = vld [vmem:[%s2972_s6 + $0x130] sm:$0xff] }
 0x332   :  { %1014 = vmatpush.msra.mxu1 %v952_v3  ;;  %v2741_v3 = vld [vmem:[%s2971_s5] ss:$0 sm:$0xff] }
 0x333   :  { %1584 = vmatmul.msk.f32.gmra.mxu1 %vm214_vm3, %v2421_v7 }
 0x334   :  { %1015 = vmatpush.msra.mxu1 %v951_v10  ;;  %v869_v10 = vpop.f32.mrf.mxu3 }
 0x336   :  { %1016 = vmatpush.msra.mxu1 %v950_v13 }
 0x338   :  { %1151 = vmatpush.msrb.mxu1 %v2230_v45  ;;  %v1607_v45 = vld [vmem:[%s2972_s6 + $0x70] sm:$0xff] }
 0x339   :  { %991 = vmatpush.msra.mxu2 %v1607_v45 }
 0x33a   :  { %1152 = vmatpush.msrb.mxu1 %v2247_v49  ;;  %v1606_v49 = vld [vmem:[%s2972_s6 + $0x68] sm:$0xff] }
 0x33b   :  { %992 = vmatpush.msra.mxu2 %v1606_v49 }
 0x33c   :  { %1153 = vmatpush.msrb.mxu1 %v2262_v52  ;;  %v1605_v52 = vld [vmem:[%s2972_s6 + $0x60] sm:$0xff]  ;;  %v872_v16 = vpop.f32.mrf.mxu3 }
 0x33d   :  { %993 = vmatpush.msra.mxu2 %v1605_v52 }
 0x33e   :  { %1154 = vmatpush.msrb.mxu1 %v2277_v55  ;;  %v1622_v55 = vld [vmem:[%s2972_s6 + $0xd8] sm:$0xff] }
 0x33f   :  { %1122 = vmatpush.msrb.mxu2 %v2221_v42  ;;  %1049 = vmatpush.msrb.mxu3 %v1622_v55  ;;  %v1638_v42 = vld [vmem:[%s2972_s6 + $0x150] sm:$0xff]  ;;  %v1673_v55 = vld [vmem:[%s2972_s6 + $0x1c0] sm:$0xff] }
 0x340   :  { %1155 = vmatpush.msrb.mxu1 %v2287_v57  ;;  %v1637_v57 = vld [vmem:[%s2972_s6 + $0x148] sm:$0xff] }
 0x341   :  { %1123 = vmatpush.msrb.mxu2 %v2242_v48  ;;  %1050 = vmatpush.msrb.mxu3 %v1621_v25  ;;  %v1620_v48 = vld [vmem:[%s2972_s6 + $0xc8] sm:$0xff]  ;;  %v1672_v25 = vld [vmem:[%s2972_s6 + $0x1b8] sm:$0xff] }
 0x342   :  { %1156 = vmatpush.msrb.mxu1 %v2299_v59  ;;  %v1619_v59 = vld [vmem:[%s2972_s6 + $0xc0] sm:$0xff] }
 0x343   :  { %1124 = vmatpush.msrb.mxu2 %v2257_v51  ;;  %1051 = vmatpush.msrb.mxu3 %v1620_v48  ;;  %v1636_v51 = vld [vmem:[%s2972_s6 + $0x140] sm:$0xff] }
 0x345   :  { %1125 = vmatpush.msrb.mxu2 %v2267_v53  ;;  %1052 = vmatpush.msrb.mxu3 %v1619_v59  ;;  %v1687_v59 = vld [vmem:[%s2972_s6 + $0x228] sm:$0xff] }
 0x347   :  { %1126 = vmatpush.msrb.mxu2 %v2282_v56  ;;  %1196 = vmatpush.msra.mxu3 %v2521_v34  ;;  %v1632_v34 = vld [vmem:[%s2972_s6 + $0x120] sm:$0xff] }
 0x349   :  { %1127 = vmatpush.msrb.mxu2 %v2294_v58  ;;  %1197 = vmatpush.msra.mxu3 %v2526_v35 }
 0x34b   :  { %1198 = vmatpush.msra.mxu3 %v2533_v37 }
 0x34d   :  { %1199 = vmatpush.msra.mxu3 %v2538_v38 }
 0x34f   :  { %1200 = vmatpush.msra.mxu3 %v2545_v4  ;;  %v763_v4 = vpop.f32.mrf.mxu2 }
 0x350   :  { %v764_v15 = vadd.f32 %v763_v4, %v2665_v61  ;;  %v1680_v4 = vld [vmem:[%s2972_s6 + $0x1f0] sm:$0xff] }
 0x351   :  { %1201 = vmatpush.msra.mxu3 %v2550_v1 }
 0x357   :  { %v766_v45 = vpop.f32.mrf.mxu2 }
 0x368   :  { %v652_v43 = vpop.f32.mrf.mxu1 }
 0x369   :  { %662 = vst.msk [vmem:[#allocation2 + $0x48] sm:$0xff] %vm214_vm3, %v652_v43  ;;  %v1643_v43 = vld [vmem:[%s2972_s6 + $0x178] sm:$0xff] }
 0x36a   :  { %1078 = vmatpush.msra.mxu0 %v1643_v43 }
 0x36c   :  { %1079 = vmatpush.msra.mxu0 %v1642_v2 }
 0x36e   :  { %1080 = vmatpush.msra.mxu0 %v1641_v22 }
 0x370   :  { %1081 = vmatpush.msra.mxu0 %v1640_v24  ;;  %v1674_v24 = vld [vmem:[%s2972_s6 + $0x1c8] sm:$0xff] }
 0x378   :  { %v655_v31 = vpop.f32.mrf.mxu1 }
 0x379   :  { %663 = vst.msk [vmem:[#allocation2 + $0x50] sm:$0xff] %vm214_vm3, %v655_v31  ;;  %v1639_v31 = vld [vmem:[%s2972_s6 + $0x158] sm:$0xff] }
 0x37a   :  { %1082 = vmatpush.msra.mxu0 %v1639_v31  ;;  %v1689_v31 = vld [vmem:[%s2972_s6 + $0x238] sm:$0xff] }
 0x37c   :  { %1083 = vmatpush.msra.mxu0 %v1638_v42  ;;  %v1688_v42 = vld [vmem:[%s2972_s6 + $0x230] sm:$0xff] }
 0x37e   :  { %1084 = vmatpush.msra.mxu0 %v1637_v57 }
 0x380   :  { %1085 = vmatpush.msra.mxu0 %v1636_v51  ;;  %v1670_v51 = vld [vmem:[%s2972_s6 + $0x1a8] sm:$0xff] }
 0x382   :  { %1086 = vmatpush.msra.mxu0 %v1635_v36 }
 0x384   :  { %1087 = vmatpush.msra.mxu0 %v1634_v39  ;;  %v1669_v39 = vld [vmem:[%s2972_s6 + $0x1a0] sm:$0xff] }
 0x386   :  { %1088 = vmatpush.msra.mxu0 %v1633_v6  ;;  %v1685_v6 = vld [vmem:[%s2972_s6 + $0x218] sm:$0xff] }
 0x388   :  { %v658_v20 = vpop.f32.mrf.mxu1  ;;  %1089 = vmatpush.msra.mxu0 %v1632_v34  ;;  %v1701_v34 = vld [vmem:[%s2972_s6 + $0x290] sm:$0xff] }
 0x389   :  { %664 = vst.msk [vmem:[#allocation2 + $0x58] sm:$0xff] %vm214_vm3, %v658_v20  ;;  %v875_v20 = vpop.f32.mrf.mxu3 }
 0x38a   :  { %1246 = vmatpush.msrb.mxu0 %v2441_v40 }
 0x38c   :  { %1247 = vmatpush.msrb.mxu0 %v2446_v41 }
 0x38e   :  { %1248 = vmatpush.msrb.mxu0 %v2457_v29 }
 0x390   :  { %v757_v33 = vpop.f32.mrf.mxu1  ;;  %1249 = vmatpush.msrb.mxu0 %v2462_v60 }
 0x391   :  { %v758_v53 = vadd.f32 %v757_v33, %v2592_v26  ;;  %v923_v26 = vpop.f32.mrf.mxu0 }
 0x392   :  { %1250 = vmatpush.msrb.mxu0 %v2468_v62  ;;  %v767_v62 = vadd.f32 %v766_v45, %v2703_v32  ;;  %v1671_v32 = vld [vmem:[%s2972_s6 + $0x1b0] sm:$0xff]  ;;  %v1695_v45 = vld [vmem:[%s2972_s6 + $0x260] sm:$0xff] }
 0x394   :  { %1251 = vmatpush.msrb.mxu0 %v2474_v0 }
 0x398   :  { %v810_v28 = vpop.f32.mrf.mxu1 }
 0x399   :  { %v822_v56 = vadd.f32 %v810_v28, %v758_v53  ;;  %v926_v40 = vpop.f32.mrf.mxu0  ;;  %v1686_v53 = vld [vmem:[%s2972_s6 + $0x220] sm:$0xff]  ;;  %v1702_v28 = vld [vmem:[%s2972_s6 + $0x298] sm:$0xff] }
 0x39b   :  { %v878_v58 = vadd.f32 %v866_v27, %v822_v56  ;;  %v1668_v56 = vld [vmem:[%s2972_s6 + $0x198] sm:$0xff] }
 0x39d   :  { %v935_v35 = vadd.f32 %v923_v26, %v878_v58  ;;  %v1667_v26 = vld [vmem:[%s2972_s6 + $0x190] sm:$0xff] }
 0x39e   :  { %v1684_v58 = vld [vmem:[%s2972_s6 + $0x210] sm:$0xff] }
 0x39f   :  { %v942_v37 = vadd.f32 %v2741_v3, %v935_v35 }
 0x3a0   :  { %v813_v11 = vpop.f32.mrf.mxu1 }
 0x3a1   :  { %1776 = vtanh.f32 %v942_v37  ;;  %v823_v18 = vadd.f32 %v813_v11, %v761_v9  ;;  %v929_v60 = vpop.f32.mrf.mxu0  ;;  %v1666_v9 = vld [vmem:[%s2972_s6 + $0x188] sm:$0xff]  ;;  %v1665_v11 = vld [vmem:[%s2972_s6 + $0x180] sm:$0xff] }
 0x3a2   :  { %v1683_v37 = vld [vmem:[%s2972_s6 + $0x208] sm:$0xff] }
 0x3a3   :  { %v879_v38 = vadd.f32 %v869_v10, %v823_v18  ;;  %v1699_v10 = vld [vmem:[%s2972_s6 + $0x280] sm:$0xff] }
 0x3a4   :  { %v1682_v18 = vld [vmem:[%s2972_s6 + $0x200] sm:$0xff] }
 0x3a5   :  { %v936_v13 = vadd.f32 %v926_v40, %v879_v38  ;;  %v1681_v38 = vld [vmem:[%s2972_s6 + $0x1f8] sm:$0xff] }
 0x3a6   :  { %v1698_v40 = vld [vmem:[%s2972_s6 + $0x278] sm:$0xff] }
 0x3a7   :  { %v1777_v12 = vpop.eup %1776  ;;  %v943_v41 = vadd.f32 %v2741_v3, %v936_v13  ;;  %v1715_v13 = vld [vmem:[%s2972_s6 + $0x2f8] sm:$0xff] }
 0x3a8   :  { %v816_v1 = vpop.f32.mrf.mxu1  ;;  %1618 = vmatmul.msk.f32.vlgmr.msra.gmra.mxu1 %vm178_vm2, %v1777_v12  ;;  %v1697_v12 = vld [vmem:[%s2972_s6 + $0x270] sm:$0xff] }
 0x3a9   :  { %1778 = vtanh.f32 %v943_v41  ;;  %v824_v29 = vadd.f32 %v816_v1, %v764_v15  ;;  %v932_v21 = vpop.f32.mrf.mxu0  ;;  %v1714_v15 = vld [vmem:[%s2972_s6 + $0x2f0] sm:$0xff] }
 0x3ab   :  { %v880_v17 = vadd.f32 %v872_v16, %v824_v29  ;;  %v1679_v29 = vld [vmem:[%s2972_s6 + $0x1e8] sm:$0xff] }
 0x3ac   :  { %v1696_v16 = vld [vmem:[%s2972_s6 + $0x268] sm:$0xff] }
 0x3ad   :  { %v937_v43 = vadd.f32 %v929_v60, %v880_v17  ;;  %v1713_v17 = vld [vmem:[%s2972_s6 + $0x2e8] sm:$0xff] }
 0x3af   :  { %v1779_v19 = vpop.eup %1778  ;;  %v944_v2 = vadd.f32 %v2741_v3, %v937_v43  ;;  %v1678_v43 = vld [vmem:[%s2972_s6 + $0x1e0] sm:$0xff] }
 0x3b0   :  { %v819_v61 = vpop.f32.mrf.mxu1  ;;  %1617 = vmatmul.msk.f32.vlgmr.msra.gmra.mxu2 %vm178_vm2, %v1779_v19  ;;  %1649 = vmatmul.msk.f32.vlgmr.msrb.gmra.mxu1 %vm214_vm3, %v2414_v63  ;;  %v1675_v63 = vld [vmem:[%s2972_s6 + $0x1d0] sm:$0xff]  ;;  %v1712_v19 = vld [vmem:[%s2972_s6 + $0x2e0] sm:$0xff] }
 0x3b1   :  { %1780 = vtanh.f32 %v944_v2  ;;  %v825_v0 = vadd.f32 %v819_v61, %v767_v62  ;;  %1296 = vmatpush.msra.mxu2 %v2373_v30  ;;  %v1694_v62 = vld [vmem:[%s2972_s6 + $0x258] sm:$0xff]  ;;  %v1693_v61 = vld [vmem:[%s2972_s6 + $0x250] sm:$0xff] }
 0x3b2   :  { %v1711_v2 = vld [vmem:[%s2972_s6 + $0x2d8] sm:$0xff] }
 0x3b3   :  { %v881_v49 = vadd.f32 %v875_v20, %v825_v0  ;;  %1297 = vmatpush.msra.mxu2 %v2378_v44  ;;  %v1099_v44 = vld [vmem:[#allocation2 + $0x40] sm:$0xff]  ;;  %v1710_v20 = vld [vmem:[%s2972_s6 + $0x2d0] sm:$0xff] }
 0x3b5   :  { %v938_v22 = vadd.f32 %v932_v21, %v881_v49  ;;  %1298 = vmatpush.msra.mxu2 %v2385_v46  ;;  %v1173_v46 = vld [vmem:[#allocation2 + $0x48] sm:$0xff] }
 0x3b7   :  { %v1781_v52 = vpop.eup %1780  ;;  %v945_v23 = vadd.f32 %v2741_v3, %v938_v22  ;;  %1299 = vmatpush.msra.mxu2 %v2390_v47  ;;  %v1223_v47 = vld [vmem:[#allocation2 + $0x50] sm:$0xff]  ;;  %v1692_v22 = vld [vmem:[%s2972_s6 + $0x248] sm:$0xff] }
 0x3b8   :  { %1631 = vmatmul.msk.f32.vlgmr.msrb.gmra.mxu3 %vm178_vm2, %v1781_v52  ;;  %1645 = vmatmul.msk.f32.vlgmr.msrb.gmra.mxu2 %vm214_vm3, %v2421_v7  ;;  %v1709_v52 = vld [vmem:[%s2972_s6 + $0x2c8] sm:$0xff] }
 0x3b9   :  { %1782 = vtanh.f32 %v945_v23  ;;  %1650 = vmatmul.msk.f32.gmra.mxu1 %vm214_vm3, %v2421_v7  ;;  %1300 = vmatpush.msra.mxu2 %v2396_v50  ;;  %v1273_v50 = vld [vmem:[#allocation2 + $0x58] sm:$0xff] }
 0x3ba   :  { %1384 = vmatpush.msrb.mxu3 %v1689_v31  ;;  %v1704_v31 = vld [vmem:[%s2972_s6 + $0x2a0] sm:$0xff] }
 0x3bb   :  { %1301 = vmatpush.msra.mxu2 %v2403_v54  ;;  %v1676_v54 = vld [vmem:[%s2972_s6 + $0x1d8] sm:$0xff] }
 0x3bc   :  { %1347 = vmatpush.msra.mxu1 %v1676_v54  ;;  %1385 = vmatpush.msrb.mxu3 %v1688_v42  ;;  %v1706_v54 = vld [vmem:[%s2972_s6 + $0x2b0] sm:$0xff] }
 0x3be   :  { %1348 = vmatpush.msra.mxu1 %v1675_v63  ;;  %1386 = vmatpush.msrb.mxu3 %v1687_v59 }
 0x3bf   :  { %v1783_v30 = vpop.eup %1782 }
 0x3c0   :  { %1644 = vmatmul.msk.f32.vlgmr.msra.gmra.mxu0 %vm178_vm2, %v1783_v30  ;;  %1646 = vmatmul.msk.f32.gmra.mxu2 %vm214_vm3, %v2501_v8 }
 0x3c1   :  { %1651 = vmatmul.msk.f32.gmra.mxu1 %vm214_vm3, %v2501_v8  ;;  %1653 = vmatmul.msk.f32.vlgmr.msra.gmra.mxu3 %vm214_vm3, %v2501_v8 }
 0x3c2   :  { %1349 = vmatpush.msra.mxu1 %v1674_v24  ;;  %1387 = vmatpush.msrb.mxu3 %v1686_v53 }
 0x3c3   :  { %1421 = vmatpush.msra.mxu0 %v1702_v28 }
 0x3c4   :  { %1350 = vmatpush.msra.mxu1 %v1673_v55  ;;  %1388 = vmatpush.msrb.mxu3 %v1685_v6 }
 0x3c5   :  { %1422 = vmatpush.msra.mxu0 %v1701_v34 }
 0x3c6   :  { %1351 = vmatpush.msra.mxu1 %v1672_v25  ;;  %1389 = vmatpush.msrb.mxu3 %v1684_v58 }
 0x3c7   :  { %1423 = vmatpush.msra.mxu0 %v1700_v5 }
 0x3c8   :  { %1647 = vmatmul.msk.f32.gmra.mxu2 %vm214_vm3, %v2508_v14  ;;  %1657 = vmatmul.msk.f32.vlgmr.msrb.gmra.mxu0 %vm214_vm3, %v2508_v14 }
 0x3c9   :  { %1652 = vmatmul.msk.f32.gmra.mxu1 %vm214_vm3, %v2508_v14  ;;  %1654 = vmatmul.msk.f32.gmra.mxu3 %vm214_vm3, %v2508_v14 }
 0x3ca   :  { %1352 = vmatpush.msra.mxu1 %v1671_v32  ;;  %1390 = vmatpush.msrb.mxu3 %v1683_v37 }
 0x3cb   :  { %1424 = vmatpush.msra.mxu0 %v1699_v10 }
 0x3cc   :  { %1353 = vmatpush.msra.mxu1 %v1670_v51  ;;  %1391 = vmatpush.msrb.mxu3 %v1682_v18 }
 0x3cd   :  { %1425 = vmatpush.msra.mxu0 %v1698_v40 }
 0x3ce   :  { %1354 = vmatpush.msra.mxu1 %v1669_v39  ;;  %1392 = vmatpush.msrb.mxu3 %v1681_v38 }
 0x3cf   :  { %1426 = vmatpush.msra.mxu0 %v1697_v12 }
 0x3d0   :  { %1648 = vmatmul.msk.f32.gmra.mxu2 %vm214_vm3, %v1099_v44  ;;  %1658 = vmatmul.msk.f32.gmra.mxu0 %vm214_vm3, %v1099_v44 }
 0x3d1   :  { %1655 = vmatmul.msk.f32.gmra.mxu3 %vm214_vm3, %v1099_v44  ;;  %1355 = vmatpush.msra.mxu1 %v1668_v56 }
 0x3d2   :  { %1393 = vmatpush.msrb.mxu3 %v1680_v4  ;;  %1427 = vmatpush.msra.mxu0 %v1696_v16 }
 0x3d3   :  { %1356 = vmatpush.msra.mxu1 %v1667_v26 }
 0x3d4   :  { %1394 = vmatpush.msrb.mxu3 %v1679_v29  ;;  %1428 = vmatpush.msra.mxu0 %v1695_v45 }
 0x3d5   :  { %1357 = vmatpush.msra.mxu1 %v1666_v9 }
 0x3d6   :  { %1395 = vmatpush.msrb.mxu3 %v1678_v43  ;;  %1429 = vmatpush.msra.mxu0 %v1694_v62 }
 0x3d7   :  { %1358 = vmatpush.msra.mxu1 %v1665_v11 }
 0x3d8   :  { %1659 = vmatmul.msk.f32.gmra.mxu0 %vm214_vm3, %v1173_v46  ;;  %1661 = vmatmul.msk.f32.vlgmr.msra.gmra.mxu2 %vm214_vm3, %v1099_v44  ;;  %v1691_v44 = vld [vmem:[%s2972_s6 + $0x240] sm:$0xff] }
 0x3d9   :  { %1656 = vmatmul.msk.f32.gmra.mxu3 %vm214_vm3, %v1173_v46  ;;  %1458 = vmatpush.msrb.mxu1 %v1715_v13 }
 0x3da   :  { %1430 = vmatpush.msra.mxu0 %v1693_v61 }
 0x3db   :  { %1459 = vmatpush.msrb.mxu1 %v1714_v15 }
 0x3dc   :  { %1431 = vmatpush.msra.mxu0 %v1692_v22 }
 0x3dd   :  { %1460 = vmatpush.msrb.mxu1 %v1713_v17  ;;  %v1727_v17 = vld [vmem:[%s2973_s7] ss:$0 sm:$0xff] }
 0x3de   :  { %1432 = vmatpush.msra.mxu0 %v1691_v44 }
 0x3df   :  { %1461 = vmatpush.msrb.mxu1 %v1712_v19 }
 0x3e0   :  { %1660 = vmatmul.msk.f32.gmra.mxu0 %vm214_vm3, %v1223_v47  ;;  %1662 = vmatmul.msk.f32.gmra.mxu2 %vm214_vm3, %v1173_v46  ;;  %v1708_v46 = vld [vmem:[%s2972_s6 + $0x2c0] sm:$0xff] }
 0x3e1   :  { %1462 = vmatpush.msrb.mxu1 %v1711_v2 }
 0x3e3   :  { %1463 = vmatpush.msrb.mxu1 %v1710_v20 }
 0x3e5   :  { %1464 = vmatpush.msrb.mxu1 %v1709_v52 }
 0x3e7   :  { %1465 = vmatpush.msrb.mxu1 %v1708_v46 }
 0x3e8   :  { %1663 = vmatmul.msk.f32.gmra.mxu2 %vm214_vm3, %v1223_v47 }
 0x3f0   :  { %1664 = vmatmul.msk.f32.gmra.mxu2 %vm214_vm3, %v1273_v50  ;;  %v1707_v50 = vld [vmem:[%s2972_s6 + $0x2b8] sm:$0xff] }
 0x3f1   :  { %1466 = vmatpush.msrb.mxu1 %v1707_v50 }
 0x3f3   :  { %1467 = vmatpush.msrb.mxu1 %v1706_v54 }
 0x425   :  { %v1018_v7 = vpop.f32.mrf.mxu1 }
 0x42d   :  { %v1158_v1 = vpop.f32.mrf.mxu1 }
 0x433   :  { %v995_v8 = vpop.f32.mrf.mxu2 }
 0x434   :  { %v1019_v14 = vadd.f32 %v1018_v7, %v995_v8  ;;  %v1705_v7 = vld [vmem:[%s2972_s6 + $0x2a8] sm:$0xff] }
 0x435   :  { %1468 = vmatpush.msrb.mxu1 %v1705_v7 }
 0x436   :  { %v1161_v23 = vpop.f32.mrf.mxu1 }
 0x437   :  { %1469 = vmatpush.msrb.mxu1 %v1704_v31 }
 0x43b   :  { %v1054_v33 = vpop.f32.mrf.mxu3  ;;  %v2823_v48 = vpop.f32.mrf.mxu2 }
 0x43c   :  { %v1057_v57 = vadd.f32 %v1054_v33, %v1019_v14  ;;  %v1159_v21 = vadd.f32 %v1158_v1, %v2823_v48 }
 0x43d   :  { %v1091_v36 = vpop.f32.mrf.mxu0 }
 0x43e   :  { %v2831_v27 = vadd.f32 %v1091_v36, %v1057_v57  ;;  %v1164_v32 = vpop.f32.mrf.mxu1 }
 0x443   :  { %v2857_v35 = vpop.f32.mrf.mxu2 }
 0x444   :  { %v1203_v60 = vpop.f32.mrf.mxu3  ;;  %v1162_v24 = vadd.f32 %v1161_v23, %v2857_v35 }
 0x445   :  { %v1253_v0 = vpop.f32.mrf.mxu0  ;;  %v1215_v30 = vadd.f32 %v1203_v60, %v1159_v21 }
 0x446   :  { %v1167_v56 = vpop.f32.mrf.mxu1 }
 0x447   :  { %v1265_v63 = vadd.f32 %v1253_v0, %v1215_v30 }
 0x44b   :  { %v1135_v41 = vpop.f32.mrf.mxu2 }
 0x44c   :  { %v1206_v47 = vpop.f32.mrf.mxu3  ;;  %v1165_v59 = vadd.f32 %v1164_v32, %v1135_v41 }
 0x44d   :  { %v1256_v8 = vpop.f32.mrf.mxu0  ;;  %v1216_v25 = vadd.f32 %v1206_v47, %v1162_v24 }
 0x44f   :  { %v1266_v48 = vadd.f32 %v1256_v8, %v1216_v25 }
 0x453   :  { %v1138_v49 = vpop.f32.mrf.mxu2 }
 0x454   :  { %v1209_v33 = vpop.f32.mrf.mxu3  ;;  %v1168_v58 = vadd.f32 %v1167_v56, %v1138_v49 }
 0x455   :  { %v1259_v36 = vpop.f32.mrf.mxu0  ;;  %v1217_v39 = vadd.f32 %v1209_v33, %v1165_v59 }
 0x457   :  { %v1267_v6 = vadd.f32 %v1259_v36, %v1217_v39 }
 0x45b   :  { %v1303_v14 = vpop.f32.mrf.mxu2 }
 0x45c   :  { %v1315_v55 = vadd.f32 %v1303_v14, %v1265_v63  ;;  %v1212_v34 = vpop.f32.mrf.mxu3 }
 0x45d   :  { %v1218_v9 = vadd.f32 %v1212_v34, %v1168_v58  ;;  %v1262_v10 = vpop.f32.mrf.mxu0 }
 0x45e   :  { %v1319_v42 = vadd.f32 %v2741_v3, %v1315_v55 }
 0x45f   :  { %v1268_v11 = vadd.f32 %v1262_v10, %v1218_v9 }
 0x460   :  { %1784 = vtanh.f32 %v1319_v42 }
 0x463   :  { %v1306_v57 = vpop.f32.mrf.mxu2 }
 0x464   :  { %v1316_v51 = vadd.f32 %v1306_v57, %v1266_v48 }
 0x466   :  { %v1785_v53 = vpop.eup %1784  ;;  %v1320_v28 = vadd.f32 %v2741_v3, %v1316_v51 }
 0x467   :  { %1677 = vmatmul.msk.f32.vlgmr.msra.gmra.mxu1 %vm178_vm2, %v1785_v53 }
 0x468   :  { %1786 = vtanh.f32 %v1320_v28 }
 0x46b   :  { %v1309_v26 = vpop.f32.mrf.mxu2 }
 0x46c   :  { %v1317_v35 = vadd.f32 %v1309_v26, %v1267_v6 }
 0x46e   :  { %v1787_v5 = vpop.eup %1786  ;;  %v1321_v37 = vadd.f32 %v2741_v3, %v1317_v35 }
 0x46f   :  { %1690 = vmatmul.msk.f32.vlgmr.msrb.gmra.mxu3 %vm178_vm2, %v1787_v5 }
 0x470   :  { %1788 = vtanh.f32 %v1321_v37 }
 0x473   :  { %v1312_v18 = vpop.f32.mrf.mxu2 }
 0x474   :  { %v1318_v38 = vadd.f32 %v1312_v18, %v1268_v11 }
 0x476   :  { %v1789_v40 = vpop.eup %1788  ;;  %v1322_v13 = vadd.f32 %v2741_v3, %v1318_v38 }
 0x477   :  { %1703 = vmatmul.msk.f32.vlgmr.msra.gmra.mxu0 %vm178_vm2, %v1789_v40 }
 0x478   :  { %1790 = vtanh.f32 %v1322_v13 }
 0x47e   :  { %v1791_v4 = vpop.eup %1790 }
 0x47f   :  { %1716 = vmatmul.msk.f32.vlgmr.msrb.gmra.mxu1 %vm178_vm2, %v1791_v4 }
 0x4e4   :  { %v1360_v12 = vpop.f32.mrf.mxu1 }
 0x4e5   :  { %v1363_v41 = vadd.f32 %v1360_v12, %v2831_v27 }
 0x4f2   :  { %v1397_v15 = vpop.f32.mrf.mxu3 }
 0x4f3   :  { %v1400_v1 = vadd.f32 %v1397_v15, %v1363_v41 }
 0x4f4   :  { %v1434_v29 = vpop.f32.mrf.mxu0 }
 0x4f5   :  { %v1437_v16 = vadd.f32 %v1434_v29, %v1400_v1 }
 0x4fc   :  { %v1471_v60 = vpop.f32.mrf.mxu1 }
 0x4fd   :  { %v1474_v43 = vadd.f32 %v1471_v60, %v1437_v16 }
 0x4ff   :  { %v1479_v3 = vadd.f32 %v1727_v17, %v1474_v43 }
 0x501   :  { %1480 = vst [vmem:[%s2974_s8] sm:$0xff] %v1479_v3 }

</bundles_post_ra>
